<compile_context>
chip_gen: v7x
topology: tpu7x:2x2x1
jax: 0.10.0
libtpu: 0.0.40
codegen_flags: <defaults>
</compile_context>

<pallas_src>
import jax
import jax.numpy as jnp
from jax import lax
from jax.experimental import pallas as pl
from jax.experimental.pallas import tpu as pltpu

VMEM_LIMIT_BYTES = 32 * 1024 * 1024  # safe on v5e/v6e/v7x


def _compiler_params(**kw):
    """CompilerParams across jax versions (CompilerParams / TPUCompilerParams)."""
    cls = getattr(pltpu, "CompilerParams", None) or getattr(pltpu, "TPUCompilerParams", None)
    return cls(**kw) if cls is not None else None


# ---------------------------------------------------------------------------
# Kernel 1: conv1 (1->32, 3x3, valid) + bias + relu.  One image per grid step.
# Inputs are the even/odd-column planes of the 28x28 image: [28, 14, 1] each.
# Outputs are the even/odd-column planes of the 26x26x32 activation: [26, 13, 32].
# ---------------------------------------------------------------------------
def _conv1_relu_kernel(xe_ref, xo_ref, w1_ref, b1_ref, ye_ref, yo_ref):
    w = [w1_ref[pl.ds(t, 1), :] for t in range(9)]        # 9 x [1, 32] f32
    b = b1_ref[...]                                       # [1, 32] f32

    def row_body(ho, carry):
        acc_e = jnp.zeros((13, 32), jnp.float32)          # output cols 0,2,...,24
        acc_o = jnp.zeros((13, 32), jnp.float32)          # output cols 1,3,...,25
        for ky in range(3):
            xe0 = xe_ref[ho + ky, pl.ds(0, 13), :]        # x[., 2m]     [13, 1]
            xe1 = xe_ref[ho + ky, pl.ds(1, 13), :]        # x[., 2m + 2]
            xo0 = xo_ref[ho + ky, pl.ds(0, 13), :]        # x[., 2m + 1]
            xo1 = xo_ref[ho + ky, pl.ds(1, 13), :]        # x[., 2m + 3]
            wk0, wk1, wk2 = w[3 * ky], w[3 * ky + 1], w[3 * ky + 2]
            acc_e += xe0 * wk0 + xo0 * wk1 + xe1 * wk2    # VPU broadcast MACs
            acc_o += xo0 * wk0 + xe1 * wk1 + xo1 * wk2
        ye_ref[ho, :, :] = jnp.maximum(acc_e + b, 0.0).astype(ye_ref.dtype)
        yo_ref[ho, :, :] = jnp.maximum(acc_o + b, 0.0).astype(yo_ref.dtype)
        return carry

    lax.fori_loop(0, 26, row_body, 0)


def conv1_relu(x_e, x_o, w1, b1):
    B = x_e.shape[0]
    spec_x = pl.BlockSpec((None, 28, 14, 1), lambda b: (b, 0, 0, 0))
    spec_y = pl.BlockSpec((None, 26, 13, 32), lambda b: (b, 0, 0, 0))
    return pl.pallas_call(
        _conv1_relu_kernel,
        grid=(B,),
        in_specs=[spec_x, spec_x,
                  pl.BlockSpec((9, 32), lambda b: (0, 0)),
                  pl.BlockSpec((1, 32), lambda b: (0, 0))],
        out_specs=[spec_y, spec_y],
        out_shape=[jax.ShapeDtypeStruct((B, 26, 13, 32), jnp.bfloat16)] * 2,
        compiler_params=_compiler_params(
            dimension_semantics=("parallel",), vmem_limit_bytes=VMEM_LIMIT_BYTES),
    )(x_e, x_o, w1, b1)


# ---------------------------------------------------------------------------
# Kernel 2: conv2 (32->64, 3x3, valid) + bias + relu + fused 2x2 max-pool.
# One image per grid step; MXU matmuls over the channel contraction (K=32),
# accumulated per tap in f32.  Output is the pooled [12, 12, 64] activation.
# ---------------------------------------------------------------------------
def _conv2_relu_pool_kernel(ye_ref, yo_ref, w2_ref, b2_ref, p_ref):
    w = [w2_ref[t] for t in range(9)]                     # 9 x [32, 64] bf16
    b = b2_ref[...]                                       # [1, 64] f32

    def conv_row_pooled_w(row):
        # conv2 output row `row`, already max-pooled along W  -> [12, 64] f32
        acc_e = jnp.zeros((12, 64), jnp.float32)          # output cols 0,2,...,22
        acc_o = jnp.zeros((12, 64), jnp.float32)          # output cols 1,3,...,23
        for ky in range(3):
            e0 = ye_ref[row + ky, pl.ds(0, 12), :]        # y1[., 2m]     [12, 32]
            e1 = ye_ref[row + ky, pl.ds(1, 12), :]        # y1[., 2m + 2]
            o0 = yo_ref[row + ky, pl.ds(0, 12), :]        # y1[., 2m + 1]
            o1 = yo_ref[row + ky, pl.ds(1, 12), :]        # y1[., 2m + 3]
            wk0, wk1, wk2 = w[3 * ky], w[3 * ky + 1], w[3 * ky + 2]
            acc_e += jnp.dot(e0, wk0, preferred_element_type=jnp.float32)
            acc_e += jnp.dot(o0, wk1, preferred_element_type=jnp.float32)
            acc_e += jnp.dot(e1, wk2, preferred_element_type=jnp.float32)
            acc_o += jnp.dot(o0, wk0, preferred_element_type=jnp.float32)
            acc_o += jnp.dot(e1, wk1, preferred_element_type=jnp.float32)
            acc_o += jnp.dot(o1, wk2, preferred_element_type=jnp.float32)
        # relu(x + b) is monotone, so pooling before bias+relu is equivalent.
        return jnp.maximum(jnp.maximum(acc_e, acc_o) + b, 0.0)

    def pool_body(py, carry):
        top = conv_row_pooled_w(2 * py)
        bot = conv_row_pooled_w(2 * py + 1)
        p_ref[py, :, :] = jnp.maximum(top, bot).astype(p_ref.dtype)
        return carry

    lax.fori_loop(0, 12, pool_body, 0)


def conv2_relu_pool(y1_e, y1_o, w2, b2):
    B = y1_e.shape[0]
    spec_y = pl.BlockSpec((None, 26, 13, 32), lambda b: (b, 0, 0, 0))
    return pl.pallas_call(
        _conv2_relu_pool_kernel,
        grid=(B,),
        in_specs=[spec_y, spec_y,
                  pl.BlockSpec((9, 32, 64), lambda b: (0, 0, 0)),
                  pl.BlockSpec((1, 64), lambda b: (0, 0))],
        out_specs=pl.BlockSpec((None, 12, 12, 64), lambda b: (b, 0, 0, 0)),
        out_shape=jax.ShapeDtypeStruct((B, 12, 12, 64), jnp.bfloat16),
        compiler_params=_compiler_params(
            dimension_semantics=("parallel",), vmem_limit_bytes=VMEM_LIMIT_BYTES),
    )(y1_e, y1_o, w2, b2)


# ---------------------------------------------------------------------------
# Kernel 3: fused FC head: fc1 (9216->128) + relu + fc2 (128->128 padded) +
# log_softmax.  Grid = (M tiles, K tiles of fc1's contraction); f32 accumulator
# lives in VMEM, init at k==0, finalize (relu, fc2, log_softmax) at the last k.
# ---------------------------------------------------------------------------
def _fc_head_kernel(x_ref, w1_ref, b1_ref, w2_ref, b2_ref, o_ref, acc_ref):
    k = pl.program_id(1)

    @pl.when(k == 0)
    def _():
        acc_ref[...] = jnp.zeros_like(acc_ref)

    acc_ref[...] += jnp.dot(x_ref[...], w1_ref[...],
                            preferred_element_type=jnp.float32)

    @pl.when(k == pl.num_programs(1) - 1)
    def _():
        h = jnp.maximum(acc_ref[...] + b1_ref[...], 0.0)                     # fc1 + relu
        logits = jnp.dot(h.astype(w2_ref.dtype), w2_ref[...],
                         preferred_element_type=jnp.float32) + b2_ref[...]   # fc2 (padded)
        m = jnp.max(logits, axis=-1, keepdims=True)
        z = logits - m
        lse = jnp.log(jnp.sum(jnp.exp(z), axis=-1, keepdims=True))
        o_ref[...] = (z - lse).astype(o_ref.dtype)                           # log_softmax


def fc_head(xf, w1, b1, w2p, b2p):
    B, K = xf.shape                      # K = 9216
    N1 = w1.shape[1]                     # 128
    N2 = w2p.shape[1]                    # 128 (10 real classes + padding)
    tm = B if B < 128 else 128
    assert B % tm == 0
    tk = 1152                            # 9216 = 8 * 1152 (multiple of 128)
    assert K % tk == 0
    return pl.pallas_call(
        _fc_head_kernel,
        grid=(B // tm, K // tk),
        in_specs=[
            pl.BlockSpec((tm, tk), lambda i, k: (i, k)),
            pl.BlockSpec((tk, N1), lambda i, k: (k, 0)),
            pl.BlockSpec((1, N1), lambda i, k: (0, 0)),
            pl.BlockSpec((N1, N2), lambda i, k: (0, 0)),
            pl.BlockSpec((1, N2), lambda i, k: (0, 0)),
        ],
        out_specs=pl.BlockSpec((tm, N2), lambda i, k: (i, 0)),
        out_shape=jax.ShapeDtypeStruct((B, N2), jnp.float32),
        scratch_shapes=[pltpu.VMEM((tm, N1), jnp.float32)],
        compiler_params=_compiler_params(
            dimension_semantics=("parallel", "arbitrary"),
            vmem_limit_bytes=VMEM_LIMIT_BYTES),
    )(xf, w1, b1, w2p, b2p)


# ---------------------------------------------------------------------------
# Parameters (PyTorch layouts) and one-time prep into kernel-ready layouts.
# ---------------------------------------------------------------------------
def init_params(key):
    """Deterministic PyTorch-default-style uniform init, torch layouts."""
    ks = jax.random.split(key, 8)

    def u(k, shape, fan_in):
        bound = 1.0 / jnp.sqrt(float(fan_in))
        return jax.random.uniform(k, shape, jnp.float32, -bound, bound)

    return {
        "conv1_w": u(ks[0], (32, 1, 3, 3), 1 * 3 * 3),
        "conv1_b": u(ks[1], (32,), 1 * 3 * 3),
        "conv2_w": u(ks[2], (64, 32, 3, 3), 32 * 3 * 3),
        "conv2_b": u(ks[3], (64,), 32 * 3 * 3),
        "fc1_w": u(ks[4], (128, 9216), 9216),   # [out, in]
        "fc1_b": u(ks[5], (128,), 9216),
        "fc2_w": u(ks[6], (10, 128), 128),
        "fc2_b": u(ks[7], (10,), 128),
    }


def prepare_params(p):
    """One-time (outside the jitted forward) layout / dtype preparation."""
    # conv taps, tap-major:  w[t = ky*3+kx, ci, co]
    w1 = p["conv1_w"].reshape(32, 9).T.astype(jnp.float32)                       # [9, 32]
    b1 = p["conv1_b"].reshape(1, 32).astype(jnp.float32)
    w2 = p["conv2_w"].transpose(2, 3, 1, 0).reshape(9, 32, 64).astype(jnp.bfloat16)
    b2 = p["conv2_b"].reshape(1, 64).astype(jnp.float32)
    # fc1: torch flattens pooled activations as (c, h, w); our kernels flatten as
    # (h, w, c), so permute the weight once here and store it [in, out].
    fc1_w = (p["fc1_w"].reshape(128, 64, 12, 12)
             .transpose(0, 2, 3, 1).reshape(128, 9216).T).astype(jnp.bfloat16)   # [9216, 128]
    fc1_b = p["fc1_b"].reshape(1, 128).astype(jnp.float32)
    # fc2: pad N from 10 to 128 for a lane-dense output; pad bias with -1e30 so
    # the padded logits never affect the log_softmax.
    fc2_w = jnp.zeros((128, 128), jnp.float32).at[:, :10].set(p["fc2_w"].T)
    fc2_b = jnp.full((1, 128), -1e30, jnp.float32).at[0, :10].set(p["fc2_b"])
    return {
        "w1": w1, "b1": b1, "w2": w2, "b2": b2,
        "fc1_w": fc1_w, "fc1_b": fc1_b,
        "fc2_w": fc2_w.astype(jnp.bfloat16), "fc2_b": fc2_b,
    }


# ---------------------------------------------------------------------------
# Forward pass.
# ---------------------------------------------------------------------------
def net_forward(kp, x):
    B = x.shape[0]
    # NCHW [B,1,28,28] -> even/odd-column planes [B,28,14,1] (tiny one-time slice).
    x = x.reshape(B, 28, 28).astype(jnp.float32).reshape(B, 28, 14, 2)
    x_e = x[:, :, :, 0:1]                                   # columns 0,2,...,26
    x_o = x[:, :, :, 1:2]                                   # columns 1,3,...,27

    y1_e, y1_o = conv1_relu(x_e, x_o, kp["w1"], kp["b1"])   # [B,26,13,32] bf16 each
    pooled = conv2_relu_pool(y1_e, y1_o, kp["w2"], kp["b2"])  # [B,12,12,64] bf16
    # dropout1: identity in eval mode
    xf = pooled.reshape(B, 12 * 12 * 64)                    # (h, w, c) flatten order
    out = fc_head(xf, kp["fc1_w"], kp["fc1_b"], kp["fc2_w"], kp["fc2_b"])  # [B,128] f32
    # dropout2: identity in eval mode
    return out[:, :10]


# Pure-JAX reference (torch-faithful NCHW semantics) for a correctness check.
def ref_forward(params, x):
    def conv(x, w, b):
        y = lax.conv_general_dilated(x, w, (1, 1), "VALID",
                                     dimension_numbers=("NCHW", "OIHW", "NCHW"))
        return jax.nn.relu(y + b[None, :, None, None])

    y = conv(x, params["conv1_w"], params["conv1_b"])
    y = conv(y, params["conv2_w"], params["conv2_b"])
    y = lax.reduce_window(y, -jnp.inf, lax.max, (1, 1, 2, 2), (1, 1, 2, 2), "VALID")
    y = y.reshape(y.shape[0], -1)
    y = jax.nn.relu(y @ params["fc1_w"].T + params["fc1_b"])
    y = y @ params["fc2_w"].T + params["fc2_b"]
    return jax.nn.log_softmax(y, axis=-1)


if __name__ == "__main__":
    key = jax.random.PRNGKey(0)
    k_param, k_x = jax.random.split(key)
    params = init_params(k_param)
    kparams = prepare_params(params)      # one-time layout/dtype prep, outside jit
    # 28x28 input is forced by fc1's 9216 = 64*12*12 flattened features.
    x = jax.random.normal(k_x, (2, 1, 28, 28), dtype=jnp.float32)

    out = jax.block_until_ready(jax.jit(net_forward)(kparams, x))

    assert out.shape == (2, 10) and out.dtype == jnp.float32
    assert bool(jnp.all(jnp.isfinite(out)))
    # log_softmax rows must exponentiate-sum to ~1
    assert jnp.allclose(jnp.sum(jnp.exp(out), axis=1), 1.0, atol=1e-3)
    # cross-check against a pure-JAX f32 reference (tolerance covers bf16 weights)
    ref = jax.jit(ref_forward)(params, x)
    assert float(jnp.max(jnp.abs(out - ref))) < 0.2
    print("KERNEL_OK")
</pallas_src>

<mosaic_0001>
module attributes {stable_mosaic.version = 11 : i64} {
  func.func @_conv1_relu_kernel(%arg0: i32, %arg1: memref<1x28x14x1xf32, #tpu.memory_space<vmem>>, %arg2: memref<1x28x14x1xf32, #tpu.memory_space<vmem>>, %arg3: memref<9x32xf32, #tpu.memory_space<vmem>>, %arg4: memref<1x32xf32, #tpu.memory_space<vmem>>, %arg5: memref<1x26x13x32xbf16, #tpu.memory_space<vmem>>, %arg6: memref<1x26x13x32xbf16, #tpu.memory_space<vmem>>) attributes {dimension_semantics = [#tpu.dimension_semantics<parallel>], iteration_bounds = array<i64: 2>, scalar_prefetch = 0 : i64, scratch_operands = 0 : i64, tpu.core_type = #tpu.core_type<tc>, window_params = [{transform_indices = @transform_0, window_bounds = array<i64: 1, 28, 14, 1>}, {transform_indices = @transform_1, window_bounds = array<i64: 1, 28, 14, 1>}, {pipeline_mode = #tpu.pipeline_mode<synchronous>, transform_indices = @transform_2, window_bounds = array<i64: 9, 32>}, {pipeline_mode = #tpu.pipeline_mode<synchronous>, transform_indices = @transform_3, window_bounds = array<i64: 1, 32>}, {transform_indices = @transform_4, window_bounds = array<i64: 1, 26, 13, 32>}, {transform_indices = @transform_5, window_bounds = array<i64: 1, 26, 13, 32>}]} {
    %c0 = arith.constant 0 : index
    %c0_0 = arith.constant 0 : index
    %0 = vector.load %arg3[%c0, %c0_0] : memref<9x32xf32, #tpu.memory_space<vmem>>, vector<1x32xf32>
    %c1 = arith.constant 1 : index
    %c0_1 = arith.constant 0 : index
    %1 = vector.load %arg3[%c1, %c0_1] : memref<9x32xf32, #tpu.memory_space<vmem>>, vector<1x32xf32>
    %c2 = arith.constant 2 : index
    %c0_2 = arith.constant 0 : index
    %2 = vector.load %arg3[%c2, %c0_2] : memref<9x32xf32, #tpu.memory_space<vmem>>, vector<1x32xf32>
    %c3 = arith.constant 3 : index
    %c0_3 = arith.constant 0 : index
    %3 = vector.load %arg3[%c3, %c0_3] : memref<9x32xf32, #tpu.memory_space<vmem>>, vector<1x32xf32>
    %c4 = arith.constant 4 : index
    %c0_4 = arith.constant 0 : index
    %4 = vector.load %arg3[%c4, %c0_4] : memref<9x32xf32, #tpu.memory_space<vmem>>, vector<1x32xf32>
    %c5 = arith.constant 5 : index
    %c0_5 = arith.constant 0 : index
    %5 = vector.load %arg3[%c5, %c0_5] : memref<9x32xf32, #tpu.memory_space<vmem>>, vector<1x32xf32>
    %c6 = arith.constant 6 : index
    %c0_6 = arith.constant 0 : index
    %6 = vector.load %arg3[%c6, %c0_6] : memref<9x32xf32, #tpu.memory_space<vmem>>, vector<1x32xf32>
    %c7 = arith.constant 7 : index
    %c0_7 = arith.constant 0 : index
    %7 = vector.load %arg3[%c7, %c0_7] : memref<9x32xf32, #tpu.memory_space<vmem>>, vector<1x32xf32>
    %c8 = arith.constant 8 : index
    %c0_8 = arith.constant 0 : index
    %8 = vector.load %arg3[%c8, %c0_8] : memref<9x32xf32, #tpu.memory_space<vmem>>, vector<1x32xf32>
    %c0_9 = arith.constant 0 : index
    %c0_10 = arith.constant 0 : index
    %9 = vector.load %arg4[%c0_9, %c0_10] : memref<1x32xf32, #tpu.memory_space<vmem>>, vector<1x32xf32>
    %c0_i32 = arith.constant 0 : i32
    %c26_i32 = arith.constant 26 : i32
    %10 = arith.addi %c0_i32, %c26_i32 : i32
    %c1_i32 = arith.constant 1 : i32
    scf.for %arg7 = %c0_i32 to %10 step %c1_i32  : i32 {
      %cst = arith.constant 0.000000e+00 : f32
      %11 = vector.broadcast %cst : f32 to vector<13x32xf32>
      %cst_12 = arith.constant 0.000000e+00 : f32
      %12 = vector.broadcast %cst_12 : f32 to vector<13x32xf32>
      %c0_i32_13 = arith.constant 0 : i32
      %13 = arith.addi %arg7, %c0_i32_13 : i32
      %c0_14 = arith.constant 0 : index
      %14 = arith.index_cast %13 : i32 to index
      %c0_15 = arith.constant 0 : index
      %c0_16 = arith.constant 0 : index
      %15 = vector.load %arg1[%c0_14, %14, %c0_15, %c0_16] : memref<1x28x14x1xf32, #tpu.memory_space<vmem>>, vector<1x1x13x1xf32>
      %16 = vector.shape_cast %15 : vector<1x1x13x1xf32> to vector<13x1xf32>
      %c0_i32_17 = arith.constant 0 : i32
      %17 = arith.addi %arg7, %c0_i32_17 : i32
      %c0_18 = arith.constant 0 : index
      %18 = arith.index_cast %17 : i32 to index
      %c1_19 = arith.constant 1 : index
      %c0_20 = arith.constant 0 : index
      %19 = vector.load %arg1[%c0_18, %18, %c1_19, %c0_20] : memref<1x28x14x1xf32, #tpu.memory_space<vmem>>, vector<1x1x13x1xf32>
      %20 = vector.shape_cast %19 : vector<1x1x13x1xf32> to vector<13x1xf32>
      %c0_i32_21 = arith.constant 0 : i32
      %21 = arith.addi %arg7, %c0_i32_21 : i32
      %c0_22 = arith.constant 0 : index
      %22 = arith.index_cast %21 : i32 to index
      %c0_23 = arith.constant 0 : index
      %c0_24 = arith.constant 0 : index
      %23 = vector.load %arg2[%c0_22, %22, %c0_23, %c0_24] : memref<1x28x14x1xf32, #tpu.memory_space<vmem>>, vector<1x1x13x1xf32>
      %24 = vector.shape_cast %23 : vector<1x1x13x1xf32> to vector<13x1xf32>
      %c0_i32_25 = arith.constant 0 : i32
      %25 = arith.addi %arg7, %c0_i32_25 : i32
      %c0_26 = arith.constant 0 : index
      %26 = arith.index_cast %25 : i32 to index
      %c1_27 = arith.constant 1 : index
      %c0_28 = arith.constant 0 : index
      %27 = vector.load %arg2[%c0_26, %26, %c1_27, %c0_28] : memref<1x28x14x1xf32, #tpu.memory_space<vmem>>, vector<1x1x13x1xf32>
      %28 = vector.shape_cast %27 : vector<1x1x13x1xf32> to vector<13x1xf32>
      %29 = vector.broadcast %16 : vector<13x1xf32> to vector<13x32xf32>
      %30 = vector.broadcast %0 : vector<1x32xf32> to vector<13x32xf32>
      %31 = arith.mulf %29, %30 : vector<13x32xf32>
      %32 = vector.broadcast %24 : vector<13x1xf32> to vector<13x32xf32>
      %33 = vector.broadcast %1 : vector<1x32xf32> to vector<13x32xf32>
      %34 = arith.mulf %32, %33 : vector<13x32xf32>
      %35 = arith.addf %31, %34 : vector<13x32xf32>
      %36 = vector.broadcast %20 : vector<13x1xf32> to vector<13x32xf32>
      %37 = vector.broadcast %2 : vector<1x32xf32> to vector<13x32xf32>
      %38 = arith.mulf %36, %37 : vector<13x32xf32>
      %39 = arith.addf %35, %38 : vector<13x32xf32>
      %40 = arith.addf %11, %39 : vector<13x32xf32>
      %41 = vector.broadcast %24 : vector<13x1xf32> to vector<13x32xf32>
      %42 = vector.broadcast %0 : vector<1x32xf32> to vector<13x32xf32>
      %43 = arith.mulf %41, %42 : vector<13x32xf32>
      %44 = vector.broadcast %20 : vector<13x1xf32> to vector<13x32xf32>
      %45 = vector.broadcast %1 : vector<1x32xf32> to vector<13x32xf32>
      %46 = arith.mulf %44, %45 : vector<13x32xf32>
      %47 = arith.addf %43, %46 : vector<13x32xf32>
      %48 = vector.broadcast %28 : vector<13x1xf32> to vector<13x32xf32>
      %49 = vector.broadcast %2 : vector<1x32xf32> to vector<13x32xf32>
      %50 = arith.mulf %48, %49 : vector<13x32xf32>
      %51 = arith.addf %47, %50 : vector<13x32xf32>
      %52 = arith.addf %12, %51 : vector<13x32xf32>
      %c1_i32_29 = arith.constant 1 : i32
      %53 = arith.addi %arg7, %c1_i32_29 : i32
      %c0_30 = arith.constant 0 : index
      %54 = arith.index_cast %53 : i32 to index
      %c0_31 = arith.constant 0 : index
      %c0_32 = arith.constant 0 : index
      %55 = vector.load %arg1[%c0_30, %54, %c0_31, %c0_32] : memref<1x28x14x1xf32, #tpu.memory_space<vmem>>, vector<1x1x13x1xf32>
      %56 = vector.shape_cast %55 : vector<1x1x13x1xf32> to vector<13x1xf32>
      %c1_i32_33 = arith.constant 1 : i32
      %57 = arith.addi %arg7, %c1_i32_33 : i32
      %c0_34 = arith.constant 0 : index
      %58 = arith.index_cast %57 : i32 to index
      %c1_35 = arith.constant 1 : index
      %c0_36 = arith.constant 0 : index
      %59 = vector.load %arg1[%c0_34, %58, %c1_35, %c0_36] : memref<1x28x14x1xf32, #tpu.memory_space<vmem>>, vector<1x1x13x1xf32>
      %60 = vector.shape_cast %59 : vector<1x1x13x1xf32> to vector<13x1xf32>
      %c1_i32_37 = arith.constant 1 : i32
      %61 = arith.addi %arg7, %c1_i32_37 : i32
      %c0_38 = arith.constant 0 : index
      %62 = arith.index_cast %61 : i32 to index
      %c0_39 = arith.constant 0 : index
      %c0_40 = arith.constant 0 : index
      %63 = vector.load %arg2[%c0_38, %62, %c0_39, %c0_40] : memref<1x28x14x1xf32, #tpu.memory_space<vmem>>, vector<1x1x13x1xf32>
      %64 = vector.shape_cast %63 : vector<1x1x13x1xf32> to vector<13x1xf32>
      %c1_i32_41 = arith.constant 1 : i32
      %65 = arith.addi %arg7, %c1_i32_41 : i32
      %c0_42 = arith.constant 0 : index
      %66 = arith.index_cast %65 : i32 to index
      %c1_43 = arith.constant 1 : index
      %c0_44 = arith.constant 0 : index
      %67 = vector.load %arg2[%c0_42, %66, %c1_43, %c0_44] : memref<1x28x14x1xf32, #tpu.memory_space<vmem>>, vector<1x1x13x1xf32>
      %68 = vector.shape_cast %67 : vector<1x1x13x1xf32> to vector<13x1xf32>
      %69 = vector.broadcast %56 : vector<13x1xf32> to vector<13x32xf32>
      %70 = vector.broadcast %3 : vector<1x32xf32> to vector<13x32xf32>
      %71 = arith.mulf %69, %70 : vector<13x32xf32>
      %72 = vector.broadcast %64 : vector<13x1xf32> to vector<13x32xf32>
      %73 = vector.broadcast %4 : vector<1x32xf32> to vector<13x32xf32>
      %74 = arith.mulf %72, %73 : vector<13x32xf32>
      %75 = arith.addf %71, %74 : vector<13x32xf32>
      %76 = vector.broadcast %60 : vector<13x1xf32> to vector<13x32xf32>
      %77 = vector.broadcast %5 : vector<1x32xf32> to vector<13x32xf32>
      %78 = arith.mulf %76, %77 : vector<13x32xf32>
      %79 = arith.addf %75, %78 : vector<13x32xf32>
      %80 = arith.addf %40, %79 : vector<13x32xf32>
      %81 = vector.broadcast %64 : vector<13x1xf32> to vector<13x32xf32>
      %82 = vector.broadcast %3 : vector<1x32xf32> to vector<13x32xf32>
      %83 = arith.mulf %81, %82 : vector<13x32xf32>
      %84 = vector.broadcast %60 : vector<13x1xf32> to vector<13x32xf32>
      %85 = vector.broadcast %4 : vector<1x32xf32> to vector<13x32xf32>
      %86 = arith.mulf %84, %85 : vector<13x32xf32>
      %87 = arith.addf %83, %86 : vector<13x32xf32>
      %88 = vector.broadcast %68 : vector<13x1xf32> to vector<13x32xf32>
      %89 = vector.broadcast %5 : vector<1x32xf32> to vector<13x32xf32>
      %90 = arith.mulf %88, %89 : vector<13x32xf32>
      %91 = arith.addf %87, %90 : vector<13x32xf32>
      %92 = arith.addf %52, %91 : vector<13x32xf32>
      %c2_i32 = arith.constant 2 : i32
      %93 = arith.addi %arg7, %c2_i32 : i32
      %c0_45 = arith.constant 0 : index
      %94 = arith.index_cast %93 : i32 to index
      %c0_46 = arith.constant 0 : index
      %c0_47 = arith.constant 0 : index
      %95 = vector.load %arg1[%c0_45, %94, %c0_46, %c0_47] : memref<1x28x14x1xf32, #tpu.memory_space<vmem>>, vector<1x1x13x1xf32>
      %96 = vector.shape_cast %95 : vector<1x1x13x1xf32> to vector<13x1xf32>
      %c2_i32_48 = arith.constant 2 : i32
      %97 = arith.addi %arg7, %c2_i32_48 : i32
      %c0_49 = arith.constant 0 : index
      %98 = arith.index_cast %97 : i32 to index
      %c1_50 = arith.constant 1 : index
      %c0_51 = arith.constant 0 : index
      %99 = vector.load %arg1[%c0_49, %98, %c1_50, %c0_51] : memref<1x28x14x1xf32, #tpu.memory_space<vmem>>, vector<1x1x13x1xf32>
      %100 = vector.shape_cast %99 : vector<1x1x13x1xf32> to vector<13x1xf32>
      %c2_i32_52 = arith.constant 2 : i32
      %101 = arith.addi %arg7, %c2_i32_52 : i32
      %c0_53 = arith.constant 0 : index
      %102 = arith.index_cast %101 : i32 to index
      %c0_54 = arith.constant 0 : index
      %c0_55 = arith.constant 0 : index
      %103 = vector.load %arg2[%c0_53, %102, %c0_54, %c0_55] : memref<1x28x14x1xf32, #tpu.memory_space<vmem>>, vector<1x1x13x1xf32>
      %104 = vector.shape_cast %103 : vector<1x1x13x1xf32> to vector<13x1xf32>
      %c2_i32_56 = arith.constant 2 : i32
      %105 = arith.addi %arg7, %c2_i32_56 : i32
      %c0_57 = arith.constant 0 : index
      %106 = arith.index_cast %105 : i32 to index
      %c1_58 = arith.constant 1 : index
      %c0_59 = arith.constant 0 : index
      %107 = vector.load %arg2[%c0_57, %106, %c1_58, %c0_59] : memref<1x28x14x1xf32, #tpu.memory_space<vmem>>, vector<1x1x13x1xf32>
      %108 = vector.shape_cast %107 : vector<1x1x13x1xf32> to vector<13x1xf32>
      %109 = vector.broadcast %96 : vector<13x1xf32> to vector<13x32xf32>
      %110 = vector.broadcast %6 : vector<1x32xf32> to vector<13x32xf32>
      %111 = arith.mulf %109, %110 : vector<13x32xf32>
      %112 = vector.broadcast %104 : vector<13x1xf32> to vector<13x32xf32>
      %113 = vector.broadcast %7 : vector<1x32xf32> to vector<13x32xf32>
      %114 = arith.mulf %112, %113 : vector<13x32xf32>
      %115 = arith.addf %111, %114 : vector<13x32xf32>
      %116 = vector.broadcast %100 : vector<13x1xf32> to vector<13x32xf32>
      %117 = vector.broadcast %8 : vector<1x32xf32> to vector<13x32xf32>
      %118 = arith.mulf %116, %117 : vector<13x32xf32>
      %119 = arith.addf %115, %118 : vector<13x32xf32>
      %120 = arith.addf %80, %119 : vector<13x32xf32>
      %121 = vector.broadcast %104 : vector<13x1xf32> to vector<13x32xf32>
      %122 = vector.broadcast %6 : vector<1x32xf32> to vector<13x32xf32>
      %123 = arith.mulf %121, %122 : vector<13x32xf32>
      %124 = vector.broadcast %100 : vector<13x1xf32> to vector<13x32xf32>
      %125 = vector.broadcast %7 : vector<1x32xf32> to vector<13x32xf32>
      %126 = arith.mulf %124, %125 : vector<13x32xf32>
      %127 = arith.addf %123, %126 : vector<13x32xf32>
      %128 = vector.broadcast %108 : vector<13x1xf32> to vector<13x32xf32>
      %129 = vector.broadcast %8 : vector<1x32xf32> to vector<13x32xf32>
      %130 = arith.mulf %128, %129 : vector<13x32xf32>
      %131 = arith.addf %127, %130 : vector<13x32xf32>
      %132 = arith.addf %92, %131 : vector<13x32xf32>
      %133 = vector.broadcast %9 : vector<1x32xf32> to vector<13x32xf32>
      %134 = arith.addf %120, %133 : vector<13x32xf32>
      %cst_60 = arith.constant 0.000000e+00 : f32
      %135 = vector.broadcast %cst_60 : f32 to vector<13x32xf32>
      %136 = arith.maximumf %134, %135 : vector<13x32xf32>
      %137 = arith.truncf %136 : vector<13x32xf32> to vector<13x32xbf16>
      %c0_61 = arith.constant 0 : index
      %138 = arith.index_cast %arg7 : i32 to index
      %c0_62 = arith.constant 0 : index
      %c0_63 = arith.constant 0 : index
      %139 = vector.load %arg5[%c0_61, %138, %c0_62, %c0_63] : memref<1x26x13x32xbf16, #tpu.memory_space<vmem>>, vector<1x1x13x32xbf16>
      %140 = vector.shape_cast %139 : vector<1x1x13x32xbf16> to vector<13x32xbf16>
      %141 = vector.shape_cast %137 : vector<13x32xbf16> to vector<1x1x13x32xbf16>
      tpu.vector_store %arg5[%c0_61, %138, %c0_62, %c0_63], %141 {strides = array<i32>} : memref<1x26x13x32xbf16, #tpu.memory_space<vmem>>, vector<1x1x13x32xbf16>,
      %142 = vector.broadcast %9 : vector<1x32xf32> to vector<13x32xf32>
      %143 = arith.addf %132, %142 : vector<13x32xf32>
      %cst_64 = arith.constant 0.000000e+00 : f32
      %144 = vector.broadcast %cst_64 : f32 to vector<13x32xf32>
      %145 = arith.maximumf %143, %144 : vector<13x32xf32>
      %146 = arith.truncf %145 : vector<13x32xf32> to vector<13x32xbf16>
      %c0_65 = arith.constant 0 : index
      %147 = arith.index_cast %arg7 : i32 to index
      %c0_66 = arith.constant 0 : index
      %c0_67 = arith.constant 0 : index
      %148 = vector.load %arg6[%c0_65, %147, %c0_66, %c0_67] : memref<1x26x13x32xbf16, #tpu.memory_space<vmem>>, vector<1x1x13x32xbf16>
      %149 = vector.shape_cast %148 : vector<1x1x13x32xbf16> to vector<13x32xbf16>
      %150 = vector.shape_cast %146 : vector<13x32xbf16> to vector<1x1x13x32xbf16>
      tpu.vector_store %arg6[%c0_65, %147, %c0_66, %c0_67], %150 {strides = array<i32>} : memref<1x26x13x32xbf16, #tpu.memory_space<vmem>>, vector<1x1x13x32xbf16>,
    }
    %c26_i32_11 = arith.constant 26 : i32
    return
  }
  func.func @transform_0(%arg0: i32) -> (i32, i32, i32, i32) {
    %c0_i32 = arith.constant 0 : i32
    %c0_i32_0 = arith.constant 0 : i32
    %c0_i32_1 = arith.constant 0 : i32
    %c0_i32_2 = arith.constant 0 : i32
    return %arg0, %c0_i32, %c0_i32_0, %c0_i32_1 : i32, i32, i32, i32
  }
  func.func @transform_1(%arg0: i32) -> (i32, i32, i32, i32) {
    %c0_i32 = arith.constant 0 : i32
    %c0_i32_0 = arith.constant 0 : i32
    %c0_i32_1 = arith.constant 0 : i32
    %c0_i32_2 = arith.constant 0 : i32
    return %arg0, %c0_i32, %c0_i32_0, %c0_i32_1 : i32, i32, i32, i32
  }
  func.func @transform_2(%arg0: i32) -> (i32, i32) {
    %c0_i32 = arith.constant 0 : i32
    %c0_i32_0 = arith.constant 0 : i32
    %c0_i32_1 = arith.constant 0 : i32
    return %c0_i32, %c0_i32_0 : i32, i32
  }
  func.func @transform_3(%arg0: i32) -> (i32, i32) {
    %c0_i32 = arith.constant 0 : i32
    %c0_i32_0 = arith.constant 0 : i32
    %c0_i32_1 = arith.constant 0 : i32
    return %c0_i32, %c0_i32_0 : i32, i32
  }
  func.func @transform_4(%arg0: i32) -> (i32, i32, i32, i32) {
    %c0_i32 = arith.constant 0 : i32
    %c0_i32_0 = arith.constant 0 : i32
    %c0_i32_1 = arith.constant 0 : i32
    %c0_i32_2 = arith.constant 0 : i32
    return %arg0, %c0_i32, %c0_i32_0, %c0_i32_1 : i32, i32, i32, i32
  }
  func.func @transform_5(%arg0: i32) -> (i32, i32, i32, i32) {
    %c0_i32 = arith.constant 0 : i32
    %c0_i32_0 = arith.constant 0 : i32
    %c0_i32_1 = arith.constant 0 : i32
    %c0_i32_2 = arith.constant 0 : i32
    return %arg0, %c0_i32, %c0_i32_0, %c0_i32_1 : i32, i32, i32, i32
  }
}

module attributes {stable_mosaic.version = 11 : i64} {
  func.func @_conv2_relu_pool_kernel(%arg0: i32, %arg1: memref<1x26x13x32xbf16, #tpu.memory_space<vmem>>, %arg2: memref<1x26x13x32xbf16, #tpu.memory_space<vmem>>, %arg3: memref<9x32x64xbf16, #tpu.memory_space<vmem>>, %arg4: memref<1x64xf32, #tpu.memory_space<vmem>>, %arg5: memref<1x12x12x64xbf16, #tpu.memory_space<vmem>>) attributes {dimension_semantics = [#tpu.dimension_semantics<parallel>], iteration_bounds = array<i64: 2>, scalar_prefetch = 0 : i64, scratch_operands = 0 : i64, tpu.core_type = #tpu.core_type<tc>, window_params = [{transform_indices = @transform_0, window_bounds = array<i64: 1, 26, 13, 32>}, {transform_indices = @transform_1, window_bounds = array<i64: 1, 26, 13, 32>}, {pipeline_mode = #tpu.pipeline_mode<synchronous>, transform_indices = @transform_2, window_bounds = array<i64: 9, 32, 64>}, {pipeline_mode = #tpu.pipeline_mode<synchronous>, transform_indices = @transform_3, window_bounds = array<i64: 1, 64>}, {transform_indices = @transform_4, window_bounds = array<i64: 1, 12, 12, 64>}]} {
    %c0 = arith.constant 0 : index
    %c0_0 = arith.constant 0 : index
    %c0_1 = arith.constant 0 : index
    %0 = vector.load %arg3[%c0, %c0_0, %c0_1] : memref<9x32x64xbf16, #tpu.memory_space<vmem>>, vector<1x32x64xbf16>
    %1 = vector.shape_cast %0 : vector<1x32x64xbf16> to vector<32x64xbf16>
    %c1 = arith.constant 1 : index
    %c0_2 = arith.constant 0 : index
    %c0_3 = arith.constant 0 : index
    %2 = vector.load %arg3[%c1, %c0_2, %c0_3] : memref<9x32x64xbf16, #tpu.memory_space<vmem>>, vector<1x32x64xbf16>
    %3 = vector.shape_cast %2 : vector<1x32x64xbf16> to vector<32x64xbf16>
    %c2 = arith.constant 2 : index
    %c0_4 = arith.constant 0 : index
    %c0_5 = arith.constant 0 : index
    %4 = vector.load %arg3[%c2, %c0_4, %c0_5] : memref<9x32x64xbf16, #tpu.memory_space<vmem>>, vector<1x32x64xbf16>
    %5 = vector.shape_cast %4 : vector<1x32x64xbf16> to vector<32x64xbf16>
    %c3 = arith.constant 3 : index
    %c0_6 = arith.constant 0 : index
    %c0_7 = arith.constant 0 : index
    %6 = vector.load %arg3[%c3, %c0_6, %c0_7] : memref<9x32x64xbf16, #tpu.memory_space<vmem>>, vector<1x32x64xbf16>
    %7 = vector.shape_cast %6 : vector<1x32x64xbf16> to vector<32x64xbf16>
    %c4 = arith.constant 4 : index
    %c0_8 = arith.constant 0 : index
    %c0_9 = arith.constant 0 : index
    %8 = vector.load %arg3[%c4, %c0_8, %c0_9] : memref<9x32x64xbf16, #tpu.memory_space<vmem>>, vector<1x32x64xbf16>
    %9 = vector.shape_cast %8 : vector<1x32x64xbf16> to vector<32x64xbf16>
    %c5 = arith.constant 5 : index
    %c0_10 = arith.constant 0 : index
    %c0_11 = arith.constant 0 : index
    %10 = vector.load %arg3[%c5, %c0_10, %c0_11] : memref<9x32x64xbf16, #tpu.memory_space<vmem>>, vector<1x32x64xbf16>
    %11 = vector.shape_cast %10 : vector<1x32x64xbf16> to vector<32x64xbf16>
    %c6 = arith.constant 6 : index
    %c0_12 = arith.constant 0 : index
    %c0_13 = arith.constant 0 : index
    %12 = vector.load %arg3[%c6, %c0_12, %c0_13] : memref<9x32x64xbf16, #tpu.memory_space<vmem>>, vector<1x32x64xbf16>
    %13 = vector.shape_cast %12 : vector<1x32x64xbf16> to vector<32x64xbf16>
    %c7 = arith.constant 7 : index
    %c0_14 = arith.constant 0 : index
    %c0_15 = arith.constant 0 : index
    %14 = vector.load %arg3[%c7, %c0_14, %c0_15] : memref<9x32x64xbf16, #tpu.memory_space<vmem>>, vector<1x32x64xbf16>
    %15 = vector.shape_cast %14 : vector<1x32x64xbf16> to vector<32x64xbf16>
    %c8 = arith.constant 8 : index
    %c0_16 = arith.constant 0 : index
    %c0_17 = arith.constant 0 : index
    %16 = vector.load %arg3[%c8, %c0_16, %c0_17] : memref<9x32x64xbf16, #tpu.memory_space<vmem>>, vector<1x32x64xbf16>
    %17 = vector.shape_cast %16 : vector<1x32x64xbf16> to vector<32x64xbf16>
    %c0_18 = arith.constant 0 : index
    %c0_19 = arith.constant 0 : index
    %18 = vector.load %arg4[%c0_18, %c0_19] : memref<1x64xf32, #tpu.memory_space<vmem>>, vector<1x64xf32>
    %c0_i32 = arith.constant 0 : i32
    %c12_i32 = arith.constant 12 : i32
    %19 = arith.addi %c0_i32, %c12_i32 : i32
    %c1_i32 = arith.constant 1 : i32
    scf.for %arg6 = %c0_i32 to %19 step %c1_i32  : i32 {
      %c2_i32 = arith.constant 2 : i32
      %20 = arith.muli %c2_i32, %arg6 : i32
      %cst = arith.constant 0.000000e+00 : f32
      %21 = vector.broadcast %cst : f32 to vector<12x64xf32>
      %cst_21 = arith.constant 0.000000e+00 : f32
      %22 = vector.broadcast %cst_21 : f32 to vector<12x64xf32>
      %c0_i32_22 = arith.constant 0 : i32
      %23 = arith.addi %20, %c0_i32_22 : i32
      %c0_23 = arith.constant 0 : index
      %24 = arith.index_cast %23 : i32 to index
      %c0_24 = arith.constant 0 : index
      %c0_25 = arith.constant 0 : index
      %25 = vector.load %arg1[%c0_23, %24, %c0_24, %c0_25] : memref<1x26x13x32xbf16, #tpu.memory_space<vmem>>, vector<1x1x12x32xbf16>
      %26 = vector.shape_cast %25 : vector<1x1x12x32xbf16> to vector<12x32xbf16>
      %c0_i32_26 = arith.constant 0 : i32
      %27 = arith.addi %20, %c0_i32_26 : i32
      %c0_27 = arith.constant 0 : index
      %28 = arith.index_cast %27 : i32 to index
      %c1_28 = arith.constant 1 : index
      %c0_29 = arith.constant 0 : index
      %29 = vector.load %arg1[%c0_27, %28, %c1_28, %c0_29] : memref<1x26x13x32xbf16, #tpu.memory_space<vmem>>, vector<1x1x12x32xbf16>
      %30 = vector.shape_cast %29 : vector<1x1x12x32xbf16> to vector<12x32xbf16>
      %c0_i32_30 = arith.constant 0 : i32
      %31 = arith.addi %20, %c0_i32_30 : i32
      %c0_31 = arith.constant 0 : index
      %32 = arith.index_cast %31 : i32 to index
      %c0_32 = arith.constant 0 : index
      %c0_33 = arith.constant 0 : index
      %33 = vector.load %arg2[%c0_31, %32, %c0_32, %c0_33] : memref<1x26x13x32xbf16, #tpu.memory_space<vmem>>, vector<1x1x12x32xbf16>
      %34 = vector.shape_cast %33 : vector<1x1x12x32xbf16> to vector<12x32xbf16>
      %c0_i32_34 = arith.constant 0 : i32
      %35 = arith.addi %20, %c0_i32_34 : i32
      %c0_35 = arith.constant 0 : index
      %36 = arith.index_cast %35 : i32 to index
      %c1_36 = arith.constant 1 : index
      %c0_37 = arith.constant 0 : index
      %37 = vector.load %arg2[%c0_35, %36, %c1_36, %c0_37] : memref<1x26x13x32xbf16, #tpu.memory_space<vmem>>, vector<1x1x12x32xbf16>
      %38 = vector.shape_cast %37 : vector<1x1x12x32xbf16> to vector<12x32xbf16>
      %cst_38 = arith.constant dense<0.000000e+00> : vector<12x64xf32>
      %39 = tpu.matmul %26, %1, %cst_38 {dimension_numbers = #tpu.dot_dimension_numbers<[1], [0], [0], [1], [0, 0, 1, 1], [], []>} : vector<12x32xbf16>, vector<32x64xbf16>, vector<12x64xf32> -> vector<12x64xf32>
      %40 = arith.addf %21, %39 : vector<12x64xf32>
      %cst_39 = arith.constant dense<0.000000e+00> : vector<12x64xf32>
      %41 = tpu.matmul %34, %3, %cst_39 {dimension_numbers = #tpu.dot_dimension_numbers<[1], [0], [0], [1], [0, 0, 1, 1], [], []>} : vector<12x32xbf16>, vector<32x64xbf16>, vector<12x64xf32> -> vector<12x64xf32>
      %42 = arith.addf %40, %41 : vector<12x64xf32>
      %cst_40 = arith.constant dense<0.000000e+00> : vector<12x64xf32>
      %43 = tpu.matmul %30, %5, %cst_40 {dimension_numbers = #tpu.dot_dimension_numbers<[1], [0], [0], [1], [0, 0, 1, 1], [], []>} : vector<12x32xbf16>, vector<32x64xbf16>, vector<12x64xf32> -> vector<12x64xf32>
      %44 = arith.addf %42, %43 : vector<12x64xf32>
      %cst_41 = arith.constant dense<0.000000e+00> : vector<12x64xf32>
      %45 = tpu.matmul %34, %1, %cst_41 {dimension_numbers = #tpu.dot_dimension_numbers<[1], [0], [0], [1], [0, 0, 1, 1], [], []>} : vector<12x32xbf16>, vector<32x64xbf16>, vector<12x64xf32> -> vector<12x64xf32>
      %46 = arith.addf %22, %45 : vector<12x64xf32>
      %cst_42 = arith.constant dense<0.000000e+00> : vector<12x64xf32>
      %47 = tpu.matmul %30, %3, %cst_42 {dimension_numbers = #tpu.dot_dimension_numbers<[1], [0], [0], [1], [0, 0, 1, 1], [], []>} : vector<12x32xbf16>, vector<32x64xbf16>, vector<12x64xf32> -> vector<12x64xf32>
      %48 = arith.addf %46, %47 : vector<12x64xf32>
      %cst_43 = arith.constant dense<0.000000e+00> : vector<12x64xf32>
      %49 = tpu.matmul %38, %5, %cst_43 {dimension_numbers = #tpu.dot_dimension_numbers<[1], [0], [0], [1], [0, 0, 1, 1], [], []>} : vector<12x32xbf16>, vector<32x64xbf16>, vector<12x64xf32> -> vector<12x64xf32>
      %50 = arith.addf %48, %49 : vector<12x64xf32>
      %c1_i32_44 = arith.constant 1 : i32
      %51 = arith.addi %20, %c1_i32_44 : i32
      %c0_45 = arith.constant 0 : index
      %52 = arith.index_cast %51 : i32 to index
      %c0_46 = arith.constant 0 : index
      %c0_47 = arith.constant 0 : index
      %53 = vector.load %arg1[%c0_45, %52, %c0_46, %c0_47] : memref<1x26x13x32xbf16, #tpu.memory_space<vmem>>, vector<1x1x12x32xbf16>
      %54 = vector.shape_cast %53 : vector<1x1x12x32xbf16> to vector<12x32xbf16>
      %c1_i32_48 = arith.constant 1 : i32
      %55 = arith.addi %20, %c1_i32_48 : i32
      %c0_49 = arith.constant 0 : index
      %56 = arith.index_cast %55 : i32 to index
      %c1_50 = arith.constant 1 : index
      %c0_51 = arith.constant 0 : index
      %57 = vector.load %arg1[%c0_49, %56, %c1_50, %c0_51] : memref<1x26x13x32xbf16, #tpu.memory_space<vmem>>, vector<1x1x12x32xbf16>
      %58 = vector.shape_cast %57 : vector<1x1x12x32xbf16> to vector<12x32xbf16>
      %c1_i32_52 = arith.constant 1 : i32
      %59 = arith.addi %20, %c1_i32_52 : i32
      %c0_53 = arith.constant 0 : index
      %60 = arith.index_cast %59 : i32 to index
      %c0_54 = arith.constant 0 : index
      %c0_55 = arith.constant 0 : index
      %61 = vector.load %arg2[%c0_53, %60, %c0_54, %c0_55] : memref<1x26x13x32xbf16, #tpu.memory_space<vmem>>, vector<1x1x12x32xbf16>
      %62 = vector.shape_cast %61 : vector<1x1x12x32xbf16> to vector<12x32xbf16>
      %c1_i32_56 = arith.constant 1 : i32
      %63 = arith.addi %20, %c1_i32_56 : i32
      %c0_57 = arith.constant 0 : index
      %64 = arith.index_cast %63 : i32 to index
      %c1_58 = arith.constant 1 : index
      %c0_59 = arith.constant 0 : index
      %65 = vector.load %arg2[%c0_57, %64, %c1_58, %c0_59] : memref<1x26x13x32xbf16, #tpu.memory_space<vmem>>, vector<1x1x12x32xbf16>
      %66 = vector.shape_cast %65 : vector<1x1x12x32xbf16> to vector<12x32xbf16>
      %cst_60 = arith.constant dense<0.000000e+00> : vector<12x64xf32>
      %67 = tpu.matmul %54, %7, %cst_60 {dimension_numbers = #tpu.dot_dimension_numbers<[1], [0], [0], [1], [0, 0, 1, 1], [], []>} : vector<12x32xbf16>, vector<32x64xbf16>, vector<12x64xf32> -> vector<12x64xf32>
      %68 = arith.addf %44, %67 : vector<12x64xf32>
      %cst_61 = arith.constant dense<0.000000e+00> : vector<12x64xf32>
      %69 = tpu.matmul %62, %9, %cst_61 {dimension_numbers = #tpu.dot_dimension_numbers<[1], [0], [0], [1], [0, 0, 1, 1], [], []>} : vector<12x32xbf16>, vector<32x64xbf16>, vector<12x64xf32> -> vector<12x64xf32>
      %70 = arith.addf %68, %69 : vector<12x64xf32>
      %cst_62 = arith.constant dense<0.000000e+00> : vector<12x64xf32>
      %71 = tpu.matmul %58, %11, %cst_62 {dimension_numbers = #tpu.dot_dimension_numbers<[1], [0], [0], [1], [0, 0, 1, 1], [], []>} : vector<12x32xbf16>, vector<32x64xbf16>, vector<12x64xf32> -> vector<12x64xf32>
      %72 = arith.addf %70, %71 : vector<12x64xf32>
      %cst_63 = arith.constant dense<0.000000e+00> : vector<12x64xf32>
      %73 = tpu.matmul %62, %7, %cst_63 {dimension_numbers = #tpu.dot_dimension_numbers<[1], [0], [0], [1], [0, 0, 1, 1], [], []>} : vector<12x32xbf16>, vector<32x64xbf16>, vector<12x64xf32> -> vector<12x64xf32>
      %74 = arith.addf %50, %73 : vector<12x64xf32>
      %cst_64 = arith.constant dense<0.000000e+00> : vector<12x64xf32>
      %75 = tpu.matmul %58, %9, %cst_64 {dimension_numbers = #tpu.dot_dimension_numbers<[1], [0], [0], [1], [0, 0, 1, 1], [], []>} : vector<12x32xbf16>, vector<32x64xbf16>, vector<12x64xf32> -> vector<12x64xf32>
      %76 = arith.addf %74, %75 : vector<12x64xf32>
      %cst_65 = arith.constant dense<0.000000e+00> : vector<12x64xf32>
      %77 = tpu.matmul %66, %11, %cst_65 {dimension_numbers = #tpu.dot_dimension_numbers<[1], [0], [0], [1], [0, 0, 1, 1], [], []>} : vector<12x32xbf16>, vector<32x64xbf16>, vector<12x64xf32> -> vector<12x64xf32>
      %78 = arith.addf %76, %77 : vector<12x64xf32>
      %c2_i32_66 = arith.constant 2 : i32
      %79 = arith.addi %20, %c2_i32_66 : i32
      %c0_67 = arith.constant 0 : index
      %80 = arith.index_cast %79 : i32 to index
      %c0_68 = arith.constant 0 : index
      %c0_69 = arith.constant 0 : index
      %81 = vector.load %arg1[%c0_67, %80, %c0_68, %c0_69] : memref<1x26x13x32xbf16, #tpu.memory_space<vmem>>, vector<1x1x12x32xbf16>
      %82 = vector.shape_cast %81 : vector<1x1x12x32xbf16> to vector<12x32xbf16>
      %c2_i32_70 = arith.constant 2 : i32
      %83 = arith.addi %20, %c2_i32_70 : i32
      %c0_71 = arith.constant 0 : index
      %84 = arith.index_cast %83 : i32 to index
      %c1_72 = arith.constant 1 : index
      %c0_73 = arith.constant 0 : index
      %85 = vector.load %arg1[%c0_71, %84, %c1_72, %c0_73] : memref<1x26x13x32xbf16, #tpu.memory_space<vmem>>, vector<1x1x12x32xbf16>
      %86 = vector.shape_cast %85 : vector<1x1x12x32xbf16> to vector<12x32xbf16>
      %c2_i32_74 = arith.constant 2 : i32
      %87 = arith.addi %20, %c2_i32_74 : i32
      %c0_75 = arith.constant 0 : index
      %88 = arith.index_cast %87 : i32 to index
      %c0_76 = arith.constant 0 : index
      %c0_77 = arith.constant 0 : index
      %89 = vector.load %arg2[%c0_75, %88, %c0_76, %c0_77] : memref<1x26x13x32xbf16, #tpu.memory_space<vmem>>, vector<1x1x12x32xbf16>
      %90 = vector.shape_cast %89 : vector<1x1x12x32xbf16> to vector<12x32xbf16>
      %c2_i32_78 = arith.constant 2 : i32
      %91 = arith.addi %20, %c2_i32_78 : i32
      %c0_79 = arith.constant 0 : index
      %92 = arith.index_cast %91 : i32 to index
      %c1_80 = arith.constant 1 : index
      %c0_81 = arith.constant 0 : index
      %93 = vector.load %arg2[%c0_79, %92, %c1_80, %c0_81] : memref<1x26x13x32xbf16, #tpu.memory_space<vmem>>, vector<1x1x12x32xbf16>
      %94 = vector.shape_cast %93 : vector<1x1x12x32xbf16> to vector<12x32xbf16>
      %cst_82 = arith.constant dense<0.000000e+00> : vector<12x64xf32>
      %95 = tpu.matmul %82, %13, %cst_82 {dimension_numbers = #tpu.dot_dimension_numbers<[1], [0], [0], [1], [0, 0, 1, 1], [], []>} : vector<12x32xbf16>, vector<32x64xbf16>, vector<12x64xf32> -> vector<12x64xf32>
      %96 = arith.addf %72, %95 : vector<12x64xf32>
      %cst_83 = arith.constant dense<0.000000e+00> : vector<12x64xf32>
      %97 = tpu.matmul %90, %15, %cst_83 {dimension_numbers = #tpu.dot_dimension_numbers<[1], [0], [0], [1], [0, 0, 1, 1], [], []>} : vector<12x32xbf16>, vector<32x64xbf16>, vector<12x64xf32> -> vector<12x64xf32>
      %98 = arith.addf %96, %97 : vector<12x64xf32>
      %cst_84 = arith.constant dense<0.000000e+00> : vector<12x64xf32>
      %99 = tpu.matmul %86, %17, %cst_84 {dimension_numbers = #tpu.dot_dimension_numbers<[1], [0], [0], [1], [0, 0, 1, 1], [], []>} : vector<12x32xbf16>, vector<32x64xbf16>, vector<12x64xf32> -> vector<12x64xf32>
      %100 = arith.addf %98, %99 : vector<12x64xf32>
      %cst_85 = arith.constant dense<0.000000e+00> : vector<12x64xf32>
      %101 = tpu.matmul %90, %13, %cst_85 {dimension_numbers = #tpu.dot_dimension_numbers<[1], [0], [0], [1], [0, 0, 1, 1], [], []>} : vector<12x32xbf16>, vector<32x64xbf16>, vector<12x64xf32> -> vector<12x64xf32>
      %102 = arith.addf %78, %101 : vector<12x64xf32>
      %cst_86 = arith.constant dense<0.000000e+00> : vector<12x64xf32>
      %103 = tpu.matmul %86, %15, %cst_86 {dimension_numbers = #tpu.dot_dimension_numbers<[1], [0], [0], [1], [0, 0, 1, 1], [], []>} : vector<12x32xbf16>, vector<32x64xbf16>, vector<12x64xf32> -> vector<12x64xf32>
      %104 = arith.addf %102, %103 : vector<12x64xf32>
      %cst_87 = arith.constant dense<0.000000e+00> : vector<12x64xf32>
      %105 = tpu.matmul %94, %17, %cst_87 {dimension_numbers = #tpu.dot_dimension_numbers<[1], [0], [0], [1], [0, 0, 1, 1], [], []>} : vector<12x32xbf16>, vector<32x64xbf16>, vector<12x64xf32> -> vector<12x64xf32>
      %106 = arith.addf %104, %105 : vector<12x64xf32>
      %107 = arith.maximumf %100, %106 : vector<12x64xf32>
      %108 = vector.broadcast %18 : vector<1x64xf32> to vector<12x64xf32>
      %109 = arith.addf %107, %108 : vector<12x64xf32>
      %cst_88 = arith.constant 0.000000e+00 : f32
      %110 = vector.broadcast %cst_88 : f32 to vector<12x64xf32>
      %111 = arith.maximumf %109, %110 : vector<12x64xf32>
      %c2_i32_89 = arith.constant 2 : i32
      %112 = arith.muli %c2_i32_89, %arg6 : i32
      %c1_i32_90 = arith.constant 1 : i32
      %113 = arith.addi %112, %c1_i32_90 : i32
      %cst_91 = arith.constant 0.000000e+00 : f32
      %114 = vector.broadcast %cst_91 : f32 to vector<12x64xf32>
      %cst_92 = arith.constant 0.000000e+00 : f32
      %115 = vector.broadcast %cst_92 : f32 to vector<12x64xf32>
      %c0_i32_93 = arith.constant 0 : i32
      %116 = arith.addi %113, %c0_i32_93 : i32
      %c0_94 = arith.constant 0 : index
      %117 = arith.index_cast %116 : i32 to index
      %c0_95 = arith.constant 0 : index
      %c0_96 = arith.constant 0 : index
      %118 = vector.load %arg1[%c0_94, %117, %c0_95, %c0_96] : memref<1x26x13x32xbf16, #tpu.memory_space<vmem>>, vector<1x1x12x32xbf16>
      %119 = vector.shape_cast %118 : vector<1x1x12x32xbf16> to vector<12x32xbf16>
      %c0_i32_97 = arith.constant 0 : i32
      %120 = arith.addi %113, %c0_i32_97 : i32
      %c0_98 = arith.constant 0 : index
      %121 = arith.index_cast %120 : i32 to index
      %c1_99 = arith.constant 1 : index
      %c0_100 = arith.constant 0 : index
      %122 = vector.load %arg1[%c0_98, %121, %c1_99, %c0_100] : memref<1x26x13x32xbf16, #tpu.memory_space<vmem>>, vector<1x1x12x32xbf16>
      %123 = vector.shape_cast %122 : vector<1x1x12x32xbf16> to vector<12x32xbf16>
      %c0_i32_101 = arith.constant 0 : i32
      %124 = arith.addi %113, %c0_i32_101 : i32
      %c0_102 = arith.constant 0 : index
      %125 = arith.index_cast %124 : i32 to index
      %c0_103 = arith.constant 0 : index
      %c0_104 = arith.constant 0 : index
      %126 = vector.load %arg2[%c0_102, %125, %c0_103, %c0_104] : memref<1x26x13x32xbf16, #tpu.memory_space<vmem>>, vector<1x1x12x32xbf16>
      %127 = vector.shape_cast %126 : vector<1x1x12x32xbf16> to vector<12x32xbf16>
      %c0_i32_105 = arith.constant 0 : i32
      %128 = arith.addi %113, %c0_i32_105 : i32
      %c0_106 = arith.constant 0 : index
      %129 = arith.index_cast %128 : i32 to index
      %c1_107 = arith.constant 1 : index
      %c0_108 = arith.constant 0 : index
      %130 = vector.load %arg2[%c0_106, %129, %c1_107, %c0_108] : memref<1x26x13x32xbf16, #tpu.memory_space<vmem>>, vector<1x1x12x32xbf16>
      %131 = vector.shape_cast %130 : vector<1x1x12x32xbf16> to vector<12x32xbf16>
      %cst_109 = arith.constant dense<0.000000e+00> : vector<12x64xf32>
      %132 = tpu.matmul %119, %1, %cst_109 {dimension_numbers = #tpu.dot_dimension_numbers<[1], [0], [0], [1], [0, 0, 1, 1], [], []>} : vector<12x32xbf16>, vector<32x64xbf16>, vector<12x64xf32> -> vector<12x64xf32>
      %133 = arith.addf %114, %132 : vector<12x64xf32>
      %cst_110 = arith.constant dense<0.000000e+00> : vector<12x64xf32>
      %134 = tpu.matmul %127, %3, %cst_110 {dimension_numbers = #tpu.dot_dimension_numbers<[1], [0], [0], [1], [0, 0, 1, 1], [], []>} : vector<12x32xbf16>, vector<32x64xbf16>, vector<12x64xf32> -> vector<12x64xf32>
      %135 = arith.addf %133, %134 : vector<12x64xf32>
      %cst_111 = arith.constant dense<0.000000e+00> : vector<12x64xf32>
      %136 = tpu.matmul %123, %5, %cst_111 {dimension_numbers = #tpu.dot_dimension_numbers<[1], [0], [0], [1], [0, 0, 1, 1], [], []>} : vector<12x32xbf16>, vector<32x64xbf16>, vector<12x64xf32> -> vector<12x64xf32>
      %137 = arith.addf %135, %136 : vector<12x64xf32>
      %cst_112 = arith.constant dense<0.000000e+00> : vector<12x64xf32>
      %138 = tpu.matmul %127, %1, %cst_112 {dimension_numbers = #tpu.dot_dimension_numbers<[1], [0], [0], [1], [0, 0, 1, 1], [], []>} : vector<12x32xbf16>, vector<32x64xbf16>, vector<12x64xf32> -> vector<12x64xf32>
      %139 = arith.addf %115, %138 : vector<12x64xf32>
      %cst_113 = arith.constant dense<0.000000e+00> : vector<12x64xf32>
      %140 = tpu.matmul %123, %3, %cst_113 {dimension_numbers = #tpu.dot_dimension_numbers<[1], [0], [0], [1], [0, 0, 1, 1], [], []>} : vector<12x32xbf16>, vector<32x64xbf16>, vector<12x64xf32> -> vector<12x64xf32>
      %141 = arith.addf %139, %140 : vector<12x64xf32>
      %cst_114 = arith.constant dense<0.000000e+00> : vector<12x64xf32>
      %142 = tpu.matmul %131, %5, %cst_114 {dimension_numbers = #tpu.dot_dimension_numbers<[1], [0], [0], [1], [0, 0, 1, 1], [], []>} : vector<12x32xbf16>, vector<32x64xbf16>, vector<12x64xf32> -> vector<12x64xf32>
      %143 = arith.addf %141, %142 : vector<12x64xf32>
      %c1_i32_115 = arith.constant 1 : i32
      %144 = arith.addi %113, %c1_i32_115 : i32
      %c0_116 = arith.constant 0 : index
      %145 = arith.index_cast %144 : i32 to index
      %c0_117 = arith.constant 0 : index
      %c0_118 = arith.constant 0 : index
      %146 = vector.load %arg1[%c0_116, %145, %c0_117, %c0_118] : memref<1x26x13x32xbf16, #tpu.memory_space<vmem>>, vector<1x1x12x32xbf16>
      %147 = vector.shape_cast %146 : vector<1x1x12x32xbf16> to vector<12x32xbf16>
      %c1_i32_119 = arith.constant 1 : i32
      %148 = arith.addi %113, %c1_i32_119 : i32
      %c0_120 = arith.constant 0 : index
      %149 = arith.index_cast %148 : i32 to index
      %c1_121 = arith.constant 1 : index
      %c0_122 = arith.constant 0 : index
      %150 = vector.load %arg1[%c0_120, %149, %c1_121, %c0_122] : memref<1x26x13x32xbf16, #tpu.memory_space<vmem>>, vector<1x1x12x32xbf16>
      %151 = vector.shape_cast %150 : vector<1x1x12x32xbf16> to vector<12x32xbf16>
      %c1_i32_123 = arith.constant 1 : i32
      %152 = arith.addi %113, %c1_i32_123 : i32
      %c0_124 = arith.constant 0 : index
      %153 = arith.index_cast %152 : i32 to index
      %c0_125 = arith.constant 0 : index
      %c0_126 = arith.constant 0 : index
      %154 = vector.load %arg2[%c0_124, %153, %c0_125, %c0_126] : memref<1x26x13x32xbf16, #tpu.memory_space<vmem>>, vector<1x1x12x32xbf16>
      %155 = vector.shape_cast %154 : vector<1x1x12x32xbf16> to vector<12x32xbf16>
      %c1_i32_127 = arith.constant 1 : i32
      %156 = arith.addi %113, %c1_i32_127 : i32
      %c0_128 = arith.constant 0 : index
      %157 = arith.index_cast %156 : i32 to index
      %c1_129 = arith.constant 1 : index
      %c0_130 = arith.constant 0 : index
      %158 = vector.load %arg2[%c0_128, %157, %c1_129, %c0_130] : memref<1x26x13x32xbf16, #tpu.memory_space<vmem>>, vector<1x1x12x32xbf16>
      %159 = vector.shape_cast %158 : vector<1x1x12x32xbf16> to vector<12x32xbf16>
      %cst_131 = arith.constant dense<0.000000e+00> : vector<12x64xf32>
      %160 = tpu.matmul %147, %7, %cst_131 {dimension_numbers = #tpu.dot_dimension_numbers<[1], [0], [0], [1], [0, 0, 1, 1], [], []>} : vector<12x32xbf16>, vector<32x64xbf16>, vector<12x64xf32> -> vector<12x64xf32>
      %161 = arith.addf %137, %160 : vector<12x64xf32>
      %cst_132 = arith.constant dense<0.000000e+00> : vector<12x64xf32>
      %162 = tpu.matmul %155, %9, %cst_132 {dimension_numbers = #tpu.dot_dimension_numbers<[1], [0], [0], [1], [0, 0, 1, 1], [], []>} : vector<12x32xbf16>, vector<32x64xbf16>, vector<12x64xf32> -> vector<12x64xf32>
      %163 = arith.addf %161, %162 : vector<12x64xf32>
      %cst_133 = arith.constant dense<0.000000e+00> : vector<12x64xf32>
      %164 = tpu.matmul %151, %11, %cst_133 {dimension_numbers = #tpu.dot_dimension_numbers<[1], [0], [0], [1], [0, 0, 1, 1], [], []>} : vector<12x32xbf16>, vector<32x64xbf16>, vector<12x64xf32> -> vector<12x64xf32>
      %165 = arith.addf %163, %164 : vector<12x64xf32>
      %cst_134 = arith.constant dense<0.000000e+00> : vector<12x64xf32>
      %166 = tpu.matmul %155, %7, %cst_134 {dimension_numbers = #tpu.dot_dimension_numbers<[1], [0], [0], [1], [0, 0, 1, 1], [], []>} : vector<12x32xbf16>, vector<32x64xbf16>, vector<12x64xf32> -> vector<12x64xf32>
      %167 = arith.addf %143, %166 : vector<12x64xf32>
      %cst_135 = arith.constant dense<0.000000e+00> : vector<12x64xf32>
      %168 = tpu.matmul %151, %9, %cst_135 {dimension_numbers = #tpu.dot_dimension_numbers<[1], [0], [0], [1], [0, 0, 1, 1], [], []>} : vector<12x32xbf16>, vector<32x64xbf16>, vector<12x64xf32> -> vector<12x64xf32>
      %169 = arith.addf %167, %168 : vector<12x64xf32>
      %cst_136 = arith.constant dense<0.000000e+00> : vector<12x64xf32>
      %170 = tpu.matmul %159, %11, %cst_136 {dimension_numbers = #tpu.dot_dimension_numbers<[1], [0], [0], [1], [0, 0, 1, 1], [], []>} : vector<12x32xbf16>, vector<32x64xbf16>, vector<12x64xf32> -> vector<12x64xf32>
      %171 = arith.addf %169, %170 : vector<12x64xf32>
      %c2_i32_137 = arith.constant 2 : i32
      %172 = arith.addi %113, %c2_i32_137 : i32
      %c0_138 = arith.constant 0 : index
      %173 = arith.index_cast %172 : i32 to index
      %c0_139 = arith.constant 0 : index
      %c0_140 = arith.constant 0 : index
      %174 = vector.load %arg1[%c0_138, %173, %c0_139, %c0_140] : memref<1x26x13x32xbf16, #tpu.memory_space<vmem>>, vector<1x1x12x32xbf16>
      %175 = vector.shape_cast %174 : vector<1x1x12x32xbf16> to vector<12x32xbf16>
      %c2_i32_141 = arith.constant 2 : i32
      %176 = arith.addi %113, %c2_i32_141 : i32
      %c0_142 = arith.constant 0 : index
      %177 = arith.index_cast %176 : i32 to index
      %c1_143 = arith.constant 1 : index
      %c0_144 = arith.constant 0 : index
      %178 = vector.load %arg1[%c0_142, %177, %c1_143, %c0_144] : memref<1x26x13x32xbf16, #tpu.memory_space<vmem>>, vector<1x1x12x32xbf16>
      %179 = vector.shape_cast %178 : vector<1x1x12x32xbf16> to vector<12x32xbf16>
      %c2_i32_145 = arith.constant 2 : i32
      %180 = arith.addi %113, %c2_i32_145 : i32
      %c0_146 = arith.constant 0 : index
      %181 = arith.index_cast %180 : i32 to index
      %c0_147 = arith.constant 0 : index
      %c0_148 = arith.constant 0 : index
      %182 = vector.load %arg2[%c0_146, %181, %c0_147, %c0_148] : memref<1x26x13x32xbf16, #tpu.memory_space<vmem>>, vector<1x1x12x32xbf16>
      %183 = vector.shape_cast %182 : vector<1x1x12x32xbf16> to vector<12x32xbf16>
      %c2_i32_149 = arith.constant 2 : i32
      %184 = arith.addi %113, %c2_i32_149 : i32
      %c0_150 = arith.constant 0 : index
      %185 = arith.index_cast %184 : i32 to index
      %c1_151 = arith.constant 1 : index
      %c0_152 = arith.constant 0 : index
      %186 = vector.load %arg2[%c0_150, %185, %c1_151, %c0_152] : memref<1x26x13x32xbf16, #tpu.memory_space<vmem>>, vector<1x1x12x32xbf16>
      %187 = vector.shape_cast %186 : vector<1x1x12x32xbf16> to vector<12x32xbf16>
      %cst_153 = arith.constant dense<0.000000e+00> : vector<12x64xf32>
      %188 = tpu.matmul %175, %13, %cst_153 {dimension_numbers = #tpu.dot_dimension_numbers<[1], [0], [0], [1], [0, 0, 1, 1], [], []>} : vector<12x32xbf16>, vector<32x64xbf16>, vector<12x64xf32> -> vector<12x64xf32>
      %189 = arith.addf %165, %188 : vector<12x64xf32>
      %cst_154 = arith.constant dense<0.000000e+00> : vector<12x64xf32>
      %190 = tpu.matmul %183, %15, %cst_154 {dimension_numbers = #tpu.dot_dimension_numbers<[1], [0], [0], [1], [0, 0, 1, 1], [], []>} : vector<12x32xbf16>, vector<32x64xbf16>, vector<12x64xf32> -> vector<12x64xf32>
      %191 = arith.addf %189, %190 : vector<12x64xf32>
      %cst_155 = arith.constant dense<0.000000e+00> : vector<12x64xf32>
      %192 = tpu.matmul %179, %17, %cst_155 {dimension_numbers = #tpu.dot_dimension_numbers<[1], [0], [0], [1], [0, 0, 1, 1], [], []>} : vector<12x32xbf16>, vector<32x64xbf16>, vector<12x64xf32> -> vector<12x64xf32>
      %193 = arith.addf %191, %192 : vector<12x64xf32>
      %cst_156 = arith.constant dense<0.000000e+00> : vector<12x64xf32>
      %194 = tpu.matmul %183, %13, %cst_156 {dimension_numbers = #tpu.dot_dimension_numbers<[1], [0], [0], [1], [0, 0, 1, 1], [], []>} : vector<12x32xbf16>, vector<32x64xbf16>, vector<12x64xf32> -> vector<12x64xf32>
      %195 = arith.addf %171, %194 : vector<12x64xf32>
      %cst_157 = arith.constant dense<0.000000e+00> : vector<12x64xf32>
      %196 = tpu.matmul %179, %15, %cst_157 {dimension_numbers = #tpu.dot_dimension_numbers<[1], [0], [0], [1], [0, 0, 1, 1], [], []>} : vector<12x32xbf16>, vector<32x64xbf16>, vector<12x64xf32> -> vector<12x64xf32>
      %197 = arith.addf %195, %196 : vector<12x64xf32>
      %cst_158 = arith.constant dense<0.000000e+00> : vector<12x64xf32>
      %198 = tpu.matmul %187, %17, %cst_158 {dimension_numbers = #tpu.dot_dimension_numbers<[1], [0], [0], [1], [0, 0, 1, 1], [], []>} : vector<12x32xbf16>, vector<32x64xbf16>, vector<12x64xf32> -> vector<12x64xf32>
      %199 = arith.addf %197, %198 : vector<12x64xf32>
      %200 = arith.maximumf %193, %199 : vector<12x64xf32>
      %201 = vector.broadcast %18 : vector<1x64xf32> to vector<12x64xf32>
      %202 = arith.addf %200, %201 : vector<12x64xf32>
      %cst_159 = arith.constant 0.000000e+00 : f32
      %203 = vector.broadcast %cst_159 : f32 to vector<12x64xf32>
      %204 = arith.maximumf %202, %203 : vector<12x64xf32>
      %205 = arith.maximumf %111, %204 : vector<12x64xf32>
      %206 = arith.truncf %205 : vector<12x64xf32> to vector<12x64xbf16>
      %c0_160 = arith.constant 0 : index
      %207 = arith.index_cast %arg6 : i32 to index
      %c0_161 = arith.constant 0 : index
      %c0_162 = arith.constant 0 : index
      %208 = vector.load %arg5[%c0_160, %207, %c0_161, %c0_162] : memref<1x12x12x64xbf16, #tpu.memory_space<vmem>>, vector<1x1x12x64xbf16>
      %209 = vector.shape_cast %208 : vector<1x1x12x64xbf16> to vector<12x64xbf16>
      %210 = vector.shape_cast %206 : vector<12x64xbf16> to vector<1x1x12x64xbf16>
      tpu.vector_store %arg5[%c0_160, %207, %c0_161, %c0_162], %210 {strides = array<i32>} : memref<1x12x12x64xbf16, #tpu.memory_space<vmem>>, vector<1x1x12x64xbf16>,
    }
    %c12_i32_20 = arith.constant 12 : i32
    return
  }
  func.func @transform_0(%arg0: i32) -> (i32, i32, i32, i32) {
    %c0_i32 = arith.constant 0 : i32
    %c0_i32_0 = arith.constant 0 : i32
    %c0_i32_1 = arith.constant 0 : i32
    %c0_i32_2 = arith.constant 0 : i32
    return %arg0, %c0_i32, %c0_i32_0, %c0_i32_1 : i32, i32, i32, i32
  }
  func.func @transform_1(%arg0: i32) -> (i32, i32, i32, i32) {
    %c0_i32 = arith.constant 0 : i32
    %c0_i32_0 = arith.constant 0 : i32
    %c0_i32_1 = arith.constant 0 : i32
    %c0_i32_2 = arith.constant 0 : i32
    return %arg0, %c0_i32, %c0_i32_0, %c0_i32_1 : i32, i32, i32, i32
  }
  func.func @transform_2(%arg0: i32) -> (i32, i32, i32) {
    %c0_i32 = arith.constant 0 : i32
    %c0_i32_0 = arith.constant 0 : i32
    %c0_i32_1 = arith.constant 0 : i32
    %c0_i32_2 = arith.constant 0 : i32
    return %c0_i32, %c0_i32_0, %c0_i32_1 : i32, i32, i32
  }
  func.func @transform_3(%arg0: i32) -> (i32, i32) {
    %c0_i32 = arith.constant 0 : i32
    %c0_i32_0 = arith.constant 0 : i32
    %c0_i32_1 = arith.constant 0 : i32
    return %c0_i32, %c0_i32_0 : i32, i32
  }
  func.func @transform_4(%arg0: i32) -> (i32, i32, i32, i32) {
    %c0_i32 = arith.constant 0 : i32
    %c0_i32_0 = arith.constant 0 : i32
    %c0_i32_1 = arith.constant 0 : i32
    %c0_i32_2 = arith.constant 0 : i32
    return %arg0, %c0_i32, %c0_i32_0, %c0_i32_1 : i32, i32, i32, i32
  }
}

module attributes {stable_mosaic.version = 11 : i64} {
  func.func @_fc_head_kernel(%arg0: i32, %arg1: i32, %arg2: memref<2x1152xbf16, #tpu.memory_space<vmem>>, %arg3: memref<1152x128xbf16, #tpu.memory_space<vmem>>, %arg4: memref<1x128xf32, #tpu.memory_space<vmem>>, %arg5: memref<128x128xbf16, #tpu.memory_space<vmem>>, %arg6: memref<1x128xf32, #tpu.memory_space<vmem>>, %arg7: memref<2x128xf32, #tpu.memory_space<vmem>>, %arg8: memref<2x128xf32, #tpu.memory_space<vmem>>) attributes {dimension_semantics = [#tpu.dimension_semantics<parallel>, #tpu.dimension_semantics<arbitrary>], iteration_bounds = array<i64: 1, 8>, scalar_prefetch = 0 : i64, scratch_operands = 1 : i64, tpu.core_type = #tpu.core_type<tc>, window_params = [{transform_indices = @transform_0, window_bounds = array<i64: 2, 1152>}, {transform_indices = @transform_1, window_bounds = array<i64: 1152, 128>}, {pipeline_mode = #tpu.pipeline_mode<synchronous>, transform_indices = @transform_2, window_bounds = array<i64: 1, 128>}, {pipeline_mode = #tpu.pipeline_mode<synchronous>, transform_indices = @transform_3, window_bounds = array<i64: 128, 128>}, {pipeline_mode = #tpu.pipeline_mode<synchronous>, transform_indices = @transform_4, window_bounds = array<i64: 1, 128>}, {transform_indices = @transform_5, window_bounds = array<i64: 2, 128>}]} {
    %c0_i32 = arith.constant 0 : i32
    %0 = arith.cmpi eq, %arg1, %c0_i32 : i32
    %1 = arith.extui %0 : i1 to i32
    %c0_i32_0 = arith.constant 0 : i32
    %2 = arith.cmpi ne, %1, %c0_i32_0 : i32
    scf.if %2 {
      %cst_9 = arith.constant 0.000000e+00 : f32
      %12 = vector.broadcast %cst_9 : f32 to vector<2x128xf32>
      %c0_10 = arith.constant 0 : index
      %c0_11 = arith.constant 0 : index
      %13 = vector.load %arg8[%c0_10, %c0_11] : memref<2x128xf32, #tpu.memory_space<vmem>>, vector<2x128xf32>
      tpu.vector_store %arg8[%c0_10, %c0_11], %12 {strides = array<i32>} : memref<2x128xf32, #tpu.memory_space<vmem>>, vector<2x128xf32>,
    } else {
    }
    %c0 = arith.constant 0 : index
    %c0_1 = arith.constant 0 : index
    %3 = vector.load %arg8[%c0, %c0_1] : memref<2x128xf32, #tpu.memory_space<vmem>>, vector<2x128xf32>
    %c0_2 = arith.constant 0 : index
    %c0_3 = arith.constant 0 : index
    %4 = vector.load %arg2[%c0_2, %c0_3] : memref<2x1152xbf16, #tpu.memory_space<vmem>>, vector<2x1152xbf16>
    %c0_4 = arith.constant 0 : index
    %c0_5 = arith.constant 0 : index
    %5 = vector.load %arg3[%c0_4, %c0_5] : memref<1152x128xbf16, #tpu.memory_space<vmem>>, vector<1152x128xbf16>
    %cst = arith.constant dense<0.000000e+00> : vector<2x128xf32>
    %6 = tpu.matmul %4, %5, %cst {dimension_numbers = #tpu.dot_dimension_numbers<[1], [0], [0], [1], [0, 0, 1, 1], [], []>} : vector<2x1152xbf16>, vector<1152x128xbf16>, vector<2x128xf32> -> vector<2x128xf32>
    %7 = arith.addf %3, %6 : vector<2x128xf32>
    %c0_6 = arith.constant 0 : index
    %c0_7 = arith.constant 0 : index
    %8 = vector.load %arg8[%c0_6, %c0_7] : memref<2x128xf32, #tpu.memory_space<vmem>>, vector<2x128xf32>
    tpu.vector_store %arg8[%c0_6, %c0_7], %7 {strides = array<i32>} : memref<2x128xf32, #tpu.memory_space<vmem>>, vector<2x128xf32>,
    %c7_i32 = arith.constant 7 : i32
    %9 = arith.cmpi eq, %arg1, %c7_i32 : i32
    %10 = arith.extui %9 : i1 to i32
    %c0_i32_8 = arith.constant 0 : i32
    %11 = arith.cmpi ne, %10, %c0_i32_8 : i32
    scf.if %11 {
      %c0_9 = arith.constant 0 : index
      %c0_10 = arith.constant 0 : index
      %12 = vector.load %arg8[%c0_9, %c0_10] : memref<2x128xf32, #tpu.memory_space<vmem>>, vector<2x128xf32>
      %c0_11 = arith.constant 0 : index
      %c0_12 = arith.constant 0 : index
      %13 = vector.load %arg4[%c0_11, %c0_12] : memref<1x128xf32, #tpu.memory_space<vmem>>, vector<1x128xf32>
      %14 = vector.broadcast %13 : vector<1x128xf32> to vector<2x128xf32>
      %15 = arith.addf %12, %14 : vector<2x128xf32>
      %cst_13 = arith.constant 0.000000e+00 : f32
      %16 = vector.broadcast %cst_13 : f32 to vector<2x128xf32>
      %17 = arith.maximumf %15, %16 : vector<2x128xf32>
      %18 = arith.truncf %17 : vector<2x128xf32> to vector<2x128xbf16>
      %c0_14 = arith.constant 0 : index
      %c0_15 = arith.constant 0 : index
      %19 = vector.load %arg5[%c0_14, %c0_15] : memref<128x128xbf16, #tpu.memory_space<vmem>>, vector<128x128xbf16>
      %cst_16 = arith.constant dense<0.000000e+00> : vector<2x128xf32>
      %20 = tpu.matmul %18, %19, %cst_16 {dimension_numbers = #tpu.dot_dimension_numbers<[1], [0], [0], [1], [0, 0, 1, 1], [], []>} : vector<2x128xbf16>, vector<128x128xbf16>, vector<2x128xf32> -> vector<2x128xf32>
      %c0_17 = arith.constant 0 : index
      %c0_18 = arith.constant 0 : index
      %21 = vector.load %arg6[%c0_17, %c0_18] : memref<1x128xf32, #tpu.memory_space<vmem>>, vector<1x128xf32>
      %22 = vector.broadcast %21 : vector<1x128xf32> to vector<2x128xf32>
      %23 = arith.addf %20, %22 : vector<2x128xf32>
      %cst_19 = arith.constant dense<0xFF800000> : vector<2xf32>
      %24 = vector.multi_reduction <maximumf>, %23, %cst_19 [1] : vector<2x128xf32> to vector<2xf32>
      %25 = vector.shape_cast %24 : vector<2xf32> to vector<2x1xf32>
      %26 = vector.broadcast %25 : vector<2x1xf32> to vector<2x128xf32>
      %27 = arith.subf %23, %26 : vector<2x128xf32>
      %28 = math.exp %27 : vector<2x128xf32>
      %cst_20 = arith.constant dense<0.000000e+00> : vector<2xf32>
      %29 = vector.multi_reduction <add>, %28, %cst_20 [1] : vector<2x128xf32> to vector<2xf32>
      %30 = vector.shape_cast %29 : vector<2xf32> to vector<2x1xf32>
      %31 = math.log %30 : vector<2x1xf32>
      %32 = vector.broadcast %31 : vector<2x1xf32> to vector<2x128xf32>
      %33 = arith.subf %27, %32 : vector<2x128xf32>
      %c0_21 = arith.constant 0 : index
      %c0_22 = arith.constant 0 : index
      %34 = vector.load %arg7[%c0_21, %c0_22] : memref<2x128xf32, #tpu.memory_space<vmem>>, vector<2x128xf32>
      tpu.vector_store %arg7[%c0_21, %c0_22], %33 {strides = array<i32>} : memref<2x128xf32, #tpu.memory_space<vmem>>, vector<2x128xf32>,
    } else {
    }
    return
  }
  func.func @transform_0(%arg0: i32, %arg1: i32) -> (i32, i32) {
    %c0_i32 = arith.constant 0 : i32
    return %arg0, %arg1 : i32, i32
  }
  func.func @transform_1(%arg0: i32, %arg1: i32) -> (i32, i32) {
    %c0_i32 = arith.constant 0 : i32
    %c0_i32_0 = arith.constant 0 : i32
    return %arg1, %c0_i32 : i32, i32
  }
  func.func @transform_2(%arg0: i32, %arg1: i32) -> (i32, i32) {
    %c0_i32 = arith.constant 0 : i32
    %c0_i32_0 = arith.constant 0 : i32
    %c0_i32_1 = arith.constant 0 : i32
    return %c0_i32, %c0_i32_0 : i32, i32
  }
  func.func @transform_3(%arg0: i32, %arg1: i32) -> (i32, i32) {
    %c0_i32 = arith.constant 0 : i32
    %c0_i32_0 = arith.constant 0 : i32
    %c0_i32_1 = arith.constant 0 : i32
    return %c0_i32, %c0_i32_0 : i32, i32
  }
  func.func @transform_4(%arg0: i32, %arg1: i32) -> (i32, i32) {
    %c0_i32 = arith.constant 0 : i32
    %c0_i32_0 = arith.constant 0 : i32
    %c0_i32_1 = arith.constant 0 : i32
    return %c0_i32, %c0_i32_0 : i32, i32
  }
  func.func @transform_5(%arg0: i32, %arg1: i32) -> (i32, i32) {
    %c0_i32 = arith.constant 0 : i32
    %c0_i32_0 = arith.constant 0 : i32
    return %arg0, %c0_i32 : i32, i32
  }
}

</mosaic_0001>

<bundles_post_ra>
// kernel: net_forward.3
= control target key start
LH: loop header
LB: loop body
LE: loop exit
PB: predicated region body
PF: predicated region fallthrough
CT: control target
= control target key end

     0   :  { %11 = vsyncpa [#allocation3], 0  ;;  %s1206_s0 = inlined_call_operand.vmem [shape: f32[2,28,14,1], index: 0, kind: input, shape index: {}]   ;;  %s1207_s1 = inlined_call_operand.vmem [shape: f32[2,28,14,1], index: 1, kind: input, shape index: {}]   ;;  %s1208_s2 = inlined_call_operand.hbm [shape: f32[9,32], index: 2, kind: input, shape index: {}]   ;;  %s1209_s3 = inlined_call_operand.hbm [shape: f32[1,32], index: 3, kind: input, shape index: {}]   ;;  %s1210_s4 = inlined_call_operand.vmem [shape: bf16[2,26,13,32], index: 4, kind: output, shape index: {0}]   ;;  %s1211_s5 = inlined_call_operand.vmem [shape: bf16[2,26,13,32], index: 5, kind: output, shape index: {1}]  }
   0x1   :  { %12 = vsyncpa [#allocation5], 0  ;;  %s977_s18 = smov 0  }
   0x2 LB: > { %s983_s19 = sadd.s32 4294967295, %s936_s18   ;;  %p761_p0 = scmp.ge.s32.totalorder %s936_s18, 1  ;;  %s936_s18 = sphi %s977_s18, %s18_s18  }
   0x3   : > { %p169_p1 = scmp.lt.s32.totalorder %s936_s18, 3  ;;  %s942_s20 = smov [#allocation2]  }
   0x4   : > { %s181_s21 = sshll.u32 %s942_s20, 4  ;;  %p1212_p3 = scmp.eq.s32.totalorder %s983_s19, 0  ;;  %s182_s21 = int_to_ptr.vmem [resolvable:$true] %s181_s21 }
   0x5   : > { %p987_p2 = pnand %p761_p0, %p169_p1  ;;  %s943_s23 = smov [#allocation4]  }
   0x6   : > { %s195_s24 = sshll.u32 %s943_s23, 4  ;;  %s862_s28 = scalar_lea.hbm %s1208_s2, 256  ;;  %s1000_s24 = int_to_ptr.vmem [resolvable:$true] %s195_s24 }
   0x7   : > { %s1214_s22 = scalar_select %p987_p2, 1, 0 }
   0x8   : > { %p828_p4 = pneg %p987_p2  ;;  %p863_p6 = scmp.ne.s32.totalorder %s1208_s2, %s862_s28 }
   0x9   : > { %p869_p10 = scmp.lt.u32.totalorder %s862_s28, %s1208_s2 }
   0xa   : > { %p996_p5 = pnand %p1212_p3, %p828_p4 }
   0xc   : > { %p864_p7 = pneg %p996_p5 }
   0xe   : > { %p865_p8 = pnand %p864_p7, %p863_p6 }
  0x10   : > { %p866_p9 = pneg %p865_p8 }
  0x12   : > { %p871_p11 = pnand %p869_p10, %p866_p9 }
  0x14   : > { %874 = shalt.err (!%p871_p11)
}
  0x15   : > { %s875_s8 = scalar_lea.vmem %s182_s21, 256  ;;  %p883_p1 = scmp.lt.s32.totalorder %s182_s21, %s182_s21 }
  0x16   : > { %p876_p12 = scmp.ne.s32.totalorder %s182_s21, %s875_s8  ;;  %p884_p4 = scmp.lt.s32.totalorder %s875_s8, %s875_s8 }
  0x18   : > { %p878_p13 = pnand %p876_p12, %p864_p7  ;;  %p885_p3 = por %p884_p4, %p883_p1 }
  0x1a   : > { %p879_p0 = pneg %p878_p13 }
  0x1c   : > { %p886_p2 = pnand %p885_p3, %p879_p0 }
  0x1e   : > { %889 = shalt.err (!%p886_p2)
}
  0x1f   : > { %s944_s9 = smov 128   ;;  %s945_s10 = smov 8  }
  0x20   : > { %831 = dma.hbm_to_vmem [thread:$0]  (!%p996_p5), %s1208_s2, 256, %s182_s21, [#allocation3], %s944_s9, %s944_s9, %s945_s10  }
  0x21   : > { %s890_s15 = scalar_lea.hbm %s1209_s3, 16 }
  0x22   : > { %p891_p6 = scmp.ne.s32.totalorder %s1209_s3, %s890_s15  ;;  %p897_p8 = scmp.lt.u32.totalorder %s890_s15, %s1209_s3 }
  0x24   : > { %p893_p2 = pnand %p891_p6, %p864_p7 }
  0x26   : > { %p894_p3 = pneg %p893_p2 }
  0x28   : > { %p899_p9 = pnand %p897_p8, %p894_p3 }
  0x2a   : > { %902 = shalt.err (!%p899_p9)
}
  0x2b   : > { %s903_s21 = scalar_lea.vmem %s1000_s24, 16  ;;  %s910_s26 = scalar_lea.vmem %s1000_s24, 32 }
  0x2c   : > { %p904_p10 = scmp.ne.s32.totalorder %s1000_s24, %s903_s21  ;;  %p911_p13 = scmp.lt.s32.totalorder %s1000_s24, %s1000_s24 }
  0x2d   : > { %p912_p0 = scmp.lt.s32.totalorder %s910_s26, %s903_s21 }
  0x2e   : > { %p906_p11 = pnand %p904_p10, %p864_p7 }
  0x2f   : > { %p913_p1 = por %p912_p0, %p911_p13 }
  0x30   : > { %p907_p12 = pneg %p906_p11 }
  0x32   : > { %p914_p4 = pnand %p913_p1, %p907_p12 }
  0x34   : > { %917 = shalt.err (!%p914_p4)
}
  0x35   : > { %834 = dma.hbm_to_vmem [thread:$0]  (!%p996_p5), %s1209_s3, 16, %s1000_s24, [#allocation5]  }
  0x36   : > { %p1216_p6 = scmp.ne.s32.totalorder %s1214_s22, 0 }
  0x37   : > { %p1217_p7 = scmp.eq.s32.totalorder (!%p1216_p6), %s983_s19, 0 }
  0x38   : > { %224 = sbr.rel (%p1216_p6) target bundleno = 265 (0x109), region = 36 }
  0x3f   : > { %927 = dma.done.wait (%p1217_p7), [#allocation3], 256   ;;  %p1218_p2 = pmov %p1217_p7 }
  0x41   : > { %929 = vsyncadd (%p1218_p2), [#allocation3], 4294967040  ;;  %p1219_p3 = pmov %p1218_p2 }
  0x42   : > { %p1220_p8 = pmov %p1218_p2 }
  0x43   : > { %931 = dma.done.wait (%p1219_p3), [#allocation5], 16  }
  0x44   : > { %933 = vsyncadd (%p1220_p8), [#allocation5], 4294967280  ;;  %p266_p9 = scmp.lt.s32.totalorder %s983_s19, 1  ;;  %v1072_v0 = vld [vmem:[#allocation2] ss:$0 sm:$0xff]  ;;  %s1102_s14 = smov 0  }
  0x45   : > { %v1074_v1 = vld [vmem:[#allocation2 + $0x1] ss:$0 sm:$0xff]  ;;  %v1076_v2 = vld [vmem:[#allocation2 + $0x2] ss:$0 sm:$0xff]  ;;  %v1088_v3 = vld [vmem:[#allocation2 + $0x3] ss:$0 sm:$0xff] }
  0x46   : > { %s1224_s19 = smov (!%p266_p9, %s983_s19), 1  ;;  %v1090_v4 = vld [vmem:[#allocation2 + $0x4] ss:$0 sm:$0xff]  ;;  %v1092_v5 = vld [vmem:[#allocation2 + $0x5] ss:$0 sm:$0xff] }
  0x47   : > { %s818_s24 = smul.u32 448, %s1224_s19  ;;  %v1094_v6 = vld [vmem:[#allocation2 + $0x6] ss:$0 sm:$0xff]  ;;  %v1096_v7 = vld [vmem:[#allocation2 + $0x7] ss:$0 sm:$0xff] }
  0x48   : > { %s819_s25 = smul.u32 208, %s1224_s19  ;;  %v1098_v8 = vld [vmem:[#allocation2 + $0x8] ss:$0 sm:$0xff]  ;;  %v1100_v9 = vld [vmem:[#allocation4] ss:$0 sm:$0xff] }
  0x49   : > { %s1065_s30 = scalar_lea.vmem %s1206_s0, %s818_s24  ;;  %s1070_s8 = scalar_lea.vmem %s1207_s1, %s818_s24 }
  0x4a   : > { %s1081_s19 = scalar_lea.vmem %s1210_s4, %s819_s25  ;;  %s1086_s13 = scalar_lea.vmem %s1211_s5, %s819_s25 }
  0x4b LB: >> { %v946_v10 = vmov 0   ;;  %s772_s15 = sshll.u32 %s940_s14, 4  ;;  %vm588_vm0 = vcmask 256000   ;;  %vm589_vm1 = vsmask.f32 2304  ;;  %s814_s20 = sshll.u32 %s940_s14, 3  ;;  %s940_s14 = sphi %s1102_s14, %s301_s14  }
  0x4c   : >> { %861 = vset.pattern.permute.xlu1 %v946_v10  ;;  %860 = vset.pattern.permute.xlu0 %v946_v10  ;;  %s1109_s16 = scalar_lea.vmem %s1070_s8, %s772_s15  ;;  %s1112_s17 = scalar_lea.vmem %s1065_s30, %s772_s15  ;;  %vm1177_vm2 = vmand %vm588_vm0, %vm589_vm1  ;;  %vm586_vm3 = vcmask 257024  }
  0x4d   : >> { %v309_v11 = vld [vmem:[%s1109_s16] sm:$0xff]  ;;  %v310_v13 = vld [vmem:[%s1109_s16 + $0x8] sm:$0x1f]  ;;  %v778_v15 = vld [vmem:[%s1112_s17 + $0x18] sm:$0x1f]  ;;  %s1167_s23 = scalar_lea.vmem %s1081_s19, %s814_s20  ;;  %s607_s21 = scalar_lea.vmem %s1086_s13, %s814_s20 }
  0x4e   : >> { %v304_v12 = vld [vmem:[%s1112_s17] sm:$0xff]  ;;  %331 = vperm.xlu1 %861, %v309_v11   ;;  %v305_v14 = vld [vmem:[%s1112_s17 + $0x8] sm:$0x1f]  ;;  %v780_v17 = vld [vmem:[%s1112_s17 + $0x19] sm:$0x1f]  ;;  %s301_s14 = sadd.s32 1, %s940_s14  }
  0x4f   : >> { %315 = vperm.xlu0 %860, %v304_v12   ;;  %v307_v16 = vld [vmem:[%s1112_s17 + $0x9] sm:$0x1f]  ;;  %v783_v18 = vld [vmem:[%s1109_s16 + $0x18] sm:$0x1f]  ;;  %v777_v19 = vld [vmem:[%s1112_s17 + $0x10] sm:$0xff]  ;;  %p298_p5 = scmp.ge.s32.totalorder %s301_s14, 26  }
  0x50   : >> { %v306_v20 = vld [vmem:[%s1112_s17 + $0x1] sm:$0xff]  ;;  %v779_v21 = vld [vmem:[%s1112_s17 + $0x11] sm:$0xff]  ;;  %v785_v23 = vld [vmem:[%s1109_s16 + $0x19] sm:$0x1f] }
  0x51   : >> { %v782_v22 = vld [vmem:[%s1109_s16 + $0x10] sm:$0xff]  ;;  %v312_v24 = vld [vmem:[%s1109_s16 + $0x9] sm:$0x1f]  ;;  %v311_v27 = vld [vmem:[%s1109_s16 + $0x1] sm:$0xff] }
  0x52   : >> { %336 = vperm.xlu1 %861, %v310_v13   ;;  %v796_v25 = vld [vmem:[%s1109_s16 + $0x28] sm:$0x1f]  ;;  %v790_v29 = vld [vmem:[%s1112_s17 + $0x20] sm:$0xff]  ;;  %v784_v30 = vld [vmem:[%s1109_s16 + $0x11] sm:$0xff] }
  0x53   : >> { %320 = vperm.xlu0 %860, %v305_v14   ;;  %v791_v26 = vld [vmem:[%s1112_s17 + $0x28] sm:$0x1f]  ;;  %v795_v32 = vld [vmem:[%s1109_s16 + $0x20] sm:$0xff] }
  0x54   : >> { %v793_v28 = vld [vmem:[%s1112_s17 + $0x29] sm:$0x1f]  ;;  %v792_v31 = vld [vmem:[%s1112_s17 + $0x21] sm:$0xff] }
  0x55   : >> { %v797_v33 = vld [vmem:[%s1109_s16 + $0x21] sm:$0xff]  ;;  %v798_v34 = vld [vmem:[%s1109_s16 + $0x29] sm:$0x1f] }
  0x56   : >> { %408 = vperm.xlu1 %861, %v778_v15  }
  0x57   : >> { %354 = vperm.xlu0 %860, %v307_v16  }
  0x5a   : >> { %442 = vperm.xlu1 %861, %v780_v17  }
  0x5b   : >> { %424 = vperm.xlu0 %860, %v783_v18  }
  0x5e   : >> { %403 = vperm.xlu1 %861, %v777_v19  }
  0x5f   : >> { %349 = vperm.xlu0 %860, %v306_v20  }
  0x62   : >> { %437 = vperm.xlu1 %861, %v779_v21  }
  0x63   : >> { %419 = vperm.xlu0 %860, %v782_v22  }
  0x66   : >> { %468 = vperm.xlu1 %861, %v785_v23  }
  0x67   : >> { %380 = vperm.xlu0 %860, %v312_v24  }
  0x6a   : >> { %512 = vperm.xlu1 %861, %v796_v25  }
  0x6b   : >> { %496 = vperm.xlu0 %860, %v791_v26  }
  0x6e   : >> { %375 = vperm.xlu1 %861, %v311_v27  }
  0x6f   : >> { %530 = vperm.xlu0 %860, %v793_v28  }
  0x72   : >> { %491 = vperm.xlu1 %861, %v790_v29  }
  0x73   : >> { %463 = vperm.xlu0 %860, %v784_v30  }
  0x76   : >> { %525 = vperm.xlu1 %861, %v792_v31  }
  0x77   : >> { %507 = vperm.xlu0 %860, %v795_v32  }
  0x7a   : >> { %551 = vperm.xlu1 %861, %v797_v33  }
  0x7b   : >> { %556 = vperm.xlu0 %860, %v798_v34  }
  0xcd   : >> { %v332_v35 = vpop.permute.xlu1 %331 }
  0xce   : >> { %v316_v36 = vpop.permute.xlu0 %315  ;;  %v343_v62 = vmul.f32 %v1074_v1, %v332_v35  ;;  %v367_v22 = vmul.f32 %v1072_v0, %v332_v35 }
  0xcf   : >> { %v327_v15 = vmul.f32 %v1072_v0, %v316_v36 }
  0xd1   : >> { %v337_v37 = vpop.permute.xlu1 %336  ;;  %v345_v32 = vadd.f32 %v343_v62, %v327_v15 }
  0xd2   : >> { %v321_v38 = vpop.permute.xlu0 %320  ;;  %v344_v51 = vmul.f32 %v1074_v1, %v337_v37  ;;  %v368_v23 = vmul.f32 %v1072_v0, %v337_v37 }
  0xd3   : >> { %v328_v52 = vmul.f32 %v1072_v0, %v321_v38 }
  0xd5   : >> { %v409_v39 = vpop.permute.xlu1 %408  ;;  %v346_v60 = vadd.f32 %v344_v51, %v328_v52  ;;  %v591_v52 = vld [vmem:[%s1167_s23 + $0x4] sm:$0x7] }
  0xd6   : >> { %v355_v40 = vpop.permute.xlu0 %354  ;;  %v416_v50 = vmul.f32 %v1088_v3, %v409_v39 }
  0xd7   : >> { %v362_v56 = vmul.f32 %v1076_v2, %v355_v40  ;;  %v370_v16 = vmul.f32 %v1074_v1, %v355_v40 }
  0xd9   : >> { %v443_v41 = vpop.permute.xlu1 %442  ;;  %v364_v11 = vadd.f32 %v362_v56, %v346_v60  ;;  %v372_v33 = vadd.f32 %v370_v16, %v368_v23 }
  0xda   : >> { %v425_v42 = vpop.permute.xlu0 %424  ;;  %v450_v57 = vmul.f32 %v1092_v5, %v443_v41  ;;  %v458_v17 = vmul.f32 %v1090_v4, %v443_v41 }
  0xdb   : >> { %v432_v47 = vmul.f32 %v1090_v4, %v425_v42  ;;  %v456_v18 = vmul.f32 %v1088_v3, %v425_v42 }
  0xdd   : >> { %v404_v43 = vpop.permute.xlu1 %403  ;;  %v434_v53 = vadd.f32 %v432_v47, %v416_v50  ;;  %v460_v34 = vadd.f32 %v458_v17, %v456_v18 }
  0xde   : >> { %v350_v44 = vpop.permute.xlu0 %349  ;;  %v415_v19 = vmul.f32 %v1088_v3, %v404_v43 }
  0xdf   : >> { %v452_v61 = vadd.f32 %v450_v57, %v434_v53  ;;  %v361_v24 = vmul.f32 %v1076_v2, %v350_v44  ;;  %v369_v25 = vmul.f32 %v1074_v1, %v350_v44 }
  0xe1   : >> { %v438_v45 = vpop.permute.xlu1 %437  ;;  %v454_v20 = vadd.f32 %v452_v61, %v364_v11  ;;  %v363_v40 = vadd.f32 %v361_v24, %v345_v32  ;;  %v371_v41 = vadd.f32 %v369_v25, %v367_v22  ;;  %v609_v32 = vld [vmem:[%s607_s21 + $0x4] sm:$0x7] }
  0xe2   : >> { %v420_v46 = vpop.permute.xlu0 %419  ;;  %v457_v28 = vmul.f32 %v1090_v4, %v438_v45  ;;  %v449_v35 = vmul.f32 %v1092_v5, %v438_v45 }
  0xe3   : >> { %v431_v12 = vmul.f32 %v1090_v4, %v420_v46  ;;  %v455_v30 = vmul.f32 %v1088_v3, %v420_v46 }
  0xe5   : >> { %v469_v48 = vpop.permute.xlu1 %468  ;;  %v433_v29 = vadd.f32 %v431_v12, %v415_v19  ;;  %v459_v47 = vadd.f32 %v457_v28, %v455_v30 }
  0xe6   : >> { %v381_v49 = vpop.permute.xlu0 %380  ;;  %v472_v36 = vmul.f32 %v1092_v5, %v469_v48 }
  0xe7   : >> { %v384_v37 = vmul.f32 %v1076_v2, %v381_v49  ;;  %v451_v46 = vadd.f32 %v449_v35, %v433_v29 }
  0xe8   : >> { %v474_v57 = vadd.f32 %v472_v36, %v460_v34 }
  0xe9   : >> { %v513_v54 = vpop.permute.xlu1 %512  ;;  %v453_v16 = vadd.f32 %v451_v46, %v363_v40 }
  0xea   : >> { %v497_v55 = vpop.permute.xlu0 %496  ;;  %v520_v58 = vmul.f32 %v1096_v7, %v513_v54  ;;  %v544_v50 = vmul.f32 %v1094_v6, %v513_v54 }
  0xeb   : >> { %v504_v59 = vmul.f32 %v1094_v6, %v497_v55 }
  0xed   : >> { %v376_v63 = vpop.permute.xlu1 %375  ;;  %v522_v13 = vadd.f32 %v520_v58, %v504_v59  ;;  %v386_v58 = vadd.f32 %v384_v37, %v372_v33 }
  0xee   : >> { %v531_v10 = vpop.permute.xlu0 %530  ;;  %v383_v42 = vmul.f32 %v1076_v2, %v376_v63 }
  0xef   : >> { %v538_v14 = vmul.f32 %v1098_v8, %v531_v10  ;;  %v546_v43 = vmul.f32 %v1096_v7, %v531_v10  ;;  %v476_v18 = vadd.f32 %v474_v57, %v386_v58 }
  0xf0   : >> { %v385_v61 = vadd.f32 %v383_v42, %v371_v41 }
  0xf1   : >> { %v540_v21 = vadd.f32 %v538_v14, %v522_v13  ;;  %v492_v26 = vpop.permute.xlu1 %491  ;;  %v548_v10 = vadd.f32 %v546_v43, %v544_v50 }
  0xf2   : >> { %v464_v27 = vpop.permute.xlu0 %463  ;;  %v503_v53 = vmul.f32 %v1094_v6, %v492_v26 }
  0xf3   : >> { %v542_v31 = vadd.f32 %v540_v21, %v454_v20  ;;  %v471_v39 = vmul.f32 %v1092_v5, %v464_v27 }
  0xf5   : >> { %v572_v38 = vadd.f32 %v1100_v9, %v542_v31  ;;  %v526_v44 = vpop.permute.xlu1 %525  ;;  %v473_v60 = vadd.f32 %v471_v39, %v459_v47 }
  0xf6   : >> { %v508_v45 = vpop.permute.xlu0 %507  ;;  %v545_v49 = vmul.f32 %v1096_v7, %v526_v44  ;;  %v537_v54 = vmul.f32 %v1098_v8, %v526_v44 }
  0xf7   : >> { %v574_v48 = vmax.f32 %v572_v38, 0.0  ;;  %v519_v55 = vmul.f32 %v1096_v7, %v508_v45  ;;  %v543_v56 = vmul.f32 %v1094_v6, %v508_v45  ;;  %v475_v19 = vadd.f32 %v473_v60, %v385_v61 }
  0xf9   : >> { %v813_v59 = vpack.c.bf16 %v574_v48, %v574_v48  ;;  %v521_v62 = vadd.f32 %v519_v55, %v503_v53  ;;  %v552_v63 = vpop.permute.xlu1 %551  ;;  %v547_v13 = vadd.f32 %v545_v49, %v543_v56 }
  0xfa   : >> { %v557_v11 = vpop.permute.xlu0 %556  ;;  %v559_v14 = vmul.f32 %v1098_v8, %v552_v63 }
  0xfb   : >> { %v592_v12 = vsel %vm1177_vm2, %v813_v59, %v591_v52  ;;  %v560_v15 = vmul.f32 %v1098_v8, %v557_v11  ;;  %v539_v17 = vadd.f32 %v537_v54, %v521_v62 }
  0xfc   : >> { %593 = vst [vmem:[%s1167_s23 + $0x4] sm:$0x7] %v592_v12  ;;  %v561_v20 = vadd.f32 %v559_v14, %v547_v13 }
  0xfd   : >> { %v562_v21 = vadd.f32 %v560_v15, %v548_v10  ;;  %v541_v22 = vadd.f32 %v539_v17, %v453_v16 }
  0xfe   : >> { %v563_v23 = vadd.f32 %v561_v20, %v475_v19 }
  0xff   : >> { %v564_v24 = vadd.f32 %v562_v21, %v476_v18  ;;  %v571_v25 = vadd.f32 %v1100_v9, %v541_v22 }
 0x100   : >> { %v594_v26 = vadd.f32 %v1100_v9, %v563_v23 }
 0x101   : >> { %v595_v27 = vadd.f32 %v1100_v9, %v564_v24  ;;  %v573_v28 = vmax.f32 %v571_v25, 0.0 }
 0x102   : >> { %v596_v29 = vmax.f32 %v594_v26, 0.0  ;;  %300 = sbr.rel (!%p298_p5) target bundleno = 75 (0x4b), region = 105 }
 0x103   : >> { %v597_v30 = vmax.f32 %v595_v27, 0.0  ;;  %v812_v31 = vpack.c.bf16 %v573_v28, %v573_v28 }
 0x104   : >> { %v815_v33 = vpack.c.bf16 %v596_v29, %v596_v29 }
 0x105   : >> { %v816_v34 = vpack.c.bf16 %v597_v30, %v597_v30  ;;  %587 = vst.msk [vmem:[%s1167_s23] sm:$0xf] %vm586_vm3, %v812_v31 }
 0x106   : >> { %608 = vst.msk [vmem:[%s607_s21] sm:$0xf] %vm586_vm3, %v815_v33 }
 0x107   : >> { %v610_v35 = vsel %vm1177_vm2, %v816_v34, %v609_v32 }
 0x108   : >> { %611 = vst [vmem:[%s607_s21 + $0x4] sm:$0x7] %v610_v35 }
 0x109 PF: > { %s18_s18 = sadd.s32 1, %s936_s18  }
 0x10a   : > { %p15_p10 = scmp.ge.s32.totalorder %s18_s18, 4  }
 0x10c   :  { %17 = sbr.rel (!%p15_p10) target bundleno = 2 (0x2), region = 116 }
 0x113   :  { %649 = vsyncpa [#allocation3], 1 }
 0x114   :  { %651 = vsyncpa [#allocation3 + $0x1], 1 }
 0x115   :  { %652 = vsyncpa [#allocation5], 1 }

// kernel: net_forward.4
= control target key start
LH: loop header
LB: loop body
LE: loop exit
PB: predicated region body
PF: predicated region fallthrough
CT: control target
= control target key end

     0   :  { %9 = vsyncpa [#allocation3], 0  ;;  %s3727_s0 = inlined_call_operand.vmem [shape: bf16[2,26,13,32], index: 0, kind: input, shape index: {}]   ;;  %s3728_s1 = inlined_call_operand.vmem [shape: bf16[2,26,13,32], index: 1, kind: input, shape index: {}]   ;;  %s3729_s2 = inlined_call_operand.hbm [shape: bf16[9,32,64], index: 2, kind: input, shape index: {}]   ;;  %s3730_s3 = inlined_call_operand.hbm [shape: f32[1,64], index: 3, kind: input, shape index: {}]   ;;  %s3731_s4 = inlined_call_operand.vmem [shape: bf16[2,12,12,64], index: 4, kind: output, shape index: {}]  }
   0x1   :  { %10 = vsyncpa [#allocation5], 0  ;;  %s3141_s15 = smov 0  }
   0x2 LB: > { %s3147_s16 = sadd.s32 4294967295, %s3104_s15   ;;  %p2315_p0 = scmp.ge.s32.totalorder %s3104_s15, 1  ;;  %s3104_s15 = sphi %s3141_s15, %s16_s15  }
   0x3   : > { %p141_p1 = scmp.lt.s32.totalorder %s3104_s15, 3  ;;  %s3110_s17 = smov [#allocation2]  }
   0x4   : > { %s153_s18 = sshll.u32 %s3110_s17, 4  ;;  %p3732_p3 = scmp.eq.s32.totalorder %s3147_s16, 0  ;;  %s154_s18 = int_to_ptr.vmem [resolvable:$true] %s153_s18 }
   0x5   : > { %p3151_p2 = pnand %p2315_p0, %p141_p1  ;;  %s3111_s20 = smov [#allocation4]  }
   0x6   : > { %s167_s21 = sshll.u32 %s3111_s20, 4  ;;  %s3030_s25 = scalar_lea.hbm %s3729_s2, 2304  ;;  %s3164_s21 = int_to_ptr.vmem [resolvable:$true] %s167_s21 }
   0x7   : > { %s3734_s19 = scalar_select %p3151_p2, 1, 0 }
   0x8   : > { %p2981_p4 = pneg %p3151_p2  ;;  %p3031_p6 = scmp.ne.s32.totalorder %s3729_s2, %s3030_s25 }
   0x9   : > { %p3037_p10 = scmp.lt.u32.totalorder %s3030_s25, %s3729_s2 }
   0xa   : > { %p3160_p5 = pnand %p3732_p3, %p2981_p4 }
   0xc   : > { %p3032_p7 = pneg %p3160_p5 }
   0xe   : > { %p3033_p8 = pnand %p3032_p7, %p3031_p6 }
  0x10   : > { %p3034_p9 = pneg %p3033_p8 }
  0x12   : > { %p3039_p11 = pnand %p3037_p10, %p3034_p9 }
  0x14   : > { %3042 = shalt.err (!%p3039_p11)
}
  0x15   : > { %s3043_s30 = scalar_lea.vmem %s154_s18, 2304  ;;  %p3051_p1 = scmp.lt.s32.totalorder %s154_s18, %s154_s18 }
  0x16   : > { %p3044_p12 = scmp.ne.s32.totalorder %s154_s18, %s3043_s30  ;;  %p3052_p4 = scmp.lt.s32.totalorder %s3043_s30, %s3043_s30 }
  0x18   : > { %p3046_p13 = pnand %p3044_p12, %p3032_p7  ;;  %p3053_p3 = por %p3052_p4, %p3051_p1 }
  0x1a   : > { %p3047_p0 = pneg %p3046_p13 }
  0x1c   : > { %p3054_p2 = pnand %p3053_p3, %p3047_p0 }
  0x1e   : > { %3057 = shalt.err (!%p3054_p2)
}
  0x1f   : > { %s3112_s5 = smov 64   ;;  %s3113_s6 = smov 4  }
  0x20   : > { %2984 = dma.hbm_to_vmem [thread:$0]  (!%p3160_p5), %s3729_s2, 2304, %s154_s18, [#allocation3], %s3112_s5, %s3112_s5, %s3113_s6  }
  0x21   : > { %s3058_s11 = scalar_lea.hbm %s3730_s3, 16 }
  0x22   : > { %p3059_p6 = scmp.ne.s32.totalorder %s3730_s3, %s3058_s11  ;;  %p3065_p8 = scmp.lt.u32.totalorder %s3058_s11, %s3730_s3 }
  0x24   : > { %p3061_p2 = pnand %p3059_p6, %p3032_p7 }
  0x26   : > { %p3062_p3 = pneg %p3061_p2 }
  0x28   : > { %p3067_p9 = pnand %p3065_p8, %p3062_p3 }
  0x2a   : > { %3070 = shalt.err (!%p3067_p9)
}
  0x2b   : > { %s3071_s18 = scalar_lea.vmem %s3164_s21, 16  ;;  %s3078_s20 = scalar_lea.vmem %s3164_s21, 32 }
  0x2c   : > { %p3072_p10 = scmp.ne.s32.totalorder %s3164_s21, %s3071_s18  ;;  %p3079_p13 = scmp.lt.s32.totalorder %s3164_s21, %s3164_s21 }
  0x2d   : > { %p3080_p0 = scmp.lt.s32.totalorder %s3078_s20, %s3071_s18 }
  0x2e   : > { %p3074_p11 = pnand %p3072_p10, %p3032_p7 }
  0x2f   : > { %p3081_p1 = por %p3080_p0, %p3079_p13 }
  0x30   : > { %p3075_p12 = pneg %p3074_p11 }
  0x32   : > { %p3082_p4 = pnand %p3081_p1, %p3075_p12 }
  0x34   : > { %3085 = shalt.err (!%p3082_p4)
}
  0x35   : > { %2987 = dma.hbm_to_vmem [thread:$0]  (!%p3160_p5), %s3730_s3, 16, %s3164_s21, [#allocation5]  }
  0x36   : > { %p3736_p6 = scmp.ne.s32.totalorder %s3734_s19, 0 }
  0x37   : > { %p3737_p7 = scmp.eq.s32.totalorder (!%p3736_p6), %s3147_s16, 0 }
  0x38   : > { %196 = sbr.rel (%p3736_p6) target bundleno = 520 (0x208), region = 36 }
  0x3f   : > { %3095 = dma.done.wait (%p3737_p7), [#allocation3], 2304   ;;  %p3738_p2 = pmov %p3737_p7 }
  0x41   : > { %3097 = vsyncadd (%p3738_p2), [#allocation3], 4294964992  ;;  %p3739_p3 = pmov %p3738_p2 }
  0x42   : > { %p3740_p8 = pmov %p3738_p2 }
  0x43   : > { %3099 = dma.done.wait (%p3739_p3), [#allocation5], 16  }
  0x44   : > { %3101 = vsyncadd (%p3740_p8), [#allocation5], 4294967280  ;;  %p231_p9 = scmp.lt.s32.totalorder %s3147_s16, 1  ;;  %v3236_v0 = vld [vmem:[#allocation2] sm:$0xf]  ;;  %s3315_s6 = smov 0  }
  0x45   : > { %3741 = vst [vmem:[#allocation8_spill] sm:$0xff] %v3236_v0  ;;  %v3238_v1 = vld [vmem:[#allocation2 + $0x4] sm:$0xf]  ;;  %v3240_v2 = vld [vmem:[#allocation2 + $0x8] sm:$0xf] }
  0x46   : > { %s3754_s16 = smov (!%p231_p9, %s3147_s16), 1  ;;  %3742 = vst [vmem:[#allocation9_spill] sm:$0xff] %v3238_v1  ;;  %3743 = vst [vmem:[#allocation10_spill] sm:$0xff] %v3240_v2  ;;  %v3247_v3 = vld [vmem:[#allocation2 + $0xc] sm:$0xf] }
  0x47   : > { %s2971_s21 = smul.u32 208, %s3754_s16  ;;  %3744 = vst [vmem:[#allocation11_spill] sm:$0xff] %v3247_v3  ;;  %v3249_v4 = vld [vmem:[#allocation2 + $0x10] sm:$0xf]  ;;  %v3251_v5 = vld [vmem:[#allocation2 + $0x14] sm:$0xf] }
  0x48   : > { %s2972_s22 = smul.u32 96, %s3754_s16  ;;  %3745 = vst [vmem:[#allocation12_spill] sm:$0xff] %v3249_v4  ;;  %3746 = vst [vmem:[#allocation13_spill] sm:$0xff] %v3251_v5  ;;  %v3253_v6 = vld [vmem:[#allocation2 + $0x18] sm:$0xf] }
  0x49   : > { %s3229_s26 = scalar_lea.vmem %s3727_s0, %s2971_s21  ;;  %s3234_s29 = scalar_lea.vmem %s3728_s1, %s2971_s21  ;;  %v3255_v7 = vld [vmem:[#allocation2 + $0x1c] sm:$0xf]  ;;  %v3257_v8 = vld [vmem:[#allocation2 + $0x20] sm:$0xf]  ;;  %v3259_v9 = vld [vmem:[#allocation2 + $0x24] sm:$0xf] }
  0x4a   : > { %s3245_s16 = scalar_lea.vmem %s3731_s4, %s2972_s22  ;;  %v3261_v10 = vld [vmem:[#allocation2 + $0x28] sm:$0xf]  ;;  %v3263_v11 = vld [vmem:[#allocation2 + $0x2c] sm:$0xf]  ;;  %v3265_v12 = vld [vmem:[#allocation2 + $0x30] sm:$0xf] }
  0x4b   : > { %v3267_v13 = vld [vmem:[#allocation2 + $0x34] sm:$0xf]  ;;  %v3269_v14 = vld [vmem:[#allocation2 + $0x38] sm:$0xf]  ;;  %v3271_v15 = vld [vmem:[#allocation2 + $0x3c] sm:$0xf] }
  0x4c   : > { %v3273_v16 = vld [vmem:[#allocation2 + $0x40] sm:$0xf]  ;;  %v3275_v17 = vld [vmem:[#allocation2 + $0x44] sm:$0xf]  ;;  %v3277_v18 = vld [vmem:[#allocation2 + $0x48] sm:$0xf] }
  0x4d   : > { %v3279_v19 = vld [vmem:[#allocation2 + $0x4c] sm:$0xf]  ;;  %v3281_v20 = vld [vmem:[#allocation2 + $0x50] sm:$0xf]  ;;  %v3283_v21 = vld [vmem:[#allocation2 + $0x54] sm:$0xf] }
  0x4e   : > { %v3285_v22 = vld [vmem:[#allocation2 + $0x58] sm:$0xf]  ;;  %v3287_v23 = vld [vmem:[#allocation2 + $0x5c] sm:$0xf]  ;;  %v3289_v24 = vld [vmem:[#allocation2 + $0x60] sm:$0xf] }
  0x4f   : > { %v3291_v25 = vld [vmem:[#allocation2 + $0x64] sm:$0xf]  ;;  %v3293_v26 = vld [vmem:[#allocation2 + $0x68] sm:$0xf]  ;;  %v3295_v27 = vld [vmem:[#allocation2 + $0x6c] sm:$0xf] }
  0x50   : > { %v3297_v28 = vld [vmem:[#allocation2 + $0x70] sm:$0xf]  ;;  %v3299_v29 = vld [vmem:[#allocation2 + $0x74] sm:$0xf]  ;;  %v3301_v30 = vld [vmem:[#allocation2 + $0x78] sm:$0xf] }
  0x51   : > { %v3303_v31 = vld [vmem:[#allocation2 + $0x7c] sm:$0xf]  ;;  %v3305_v32 = vld [vmem:[#allocation2 + $0x80] sm:$0xf]  ;;  %v3307_v33 = vld [vmem:[#allocation2 + $0x84] sm:$0xf] }
  0x52   : > { %v3309_v34 = vld [vmem:[#allocation2 + $0x88] sm:$0xf]  ;;  %v3311_v35 = vld [vmem:[#allocation2 + $0x8c] sm:$0xf]  ;;  %v3313_v36 = vld [vmem:[#allocation4] ss:$0 sm:$0xff] }
  0x53 LB: >> { %v3747_v5 = vld [vmem:[#allocation13_spill] sm:$0xff]  ;;  %v3748_v4 = vld [vmem:[#allocation12_spill] sm:$0xff]  ;;  %v3114_v38 = vmov 0.0   ;;  %v3330_v39 = vcombine.low %v3253_v6, %v3255_v7  ;;  %s2436_s7 = sshll.u32 %s3108_s6, 4  ;;  %vm3115_vm0 = vmmov 0   ;;  %vm327_vm1 = vcmask 261120   ;;  %s3108_s6 = sphi %s3315_s6, %s297_s6  }
  0x54   : >> { %v3322_v37 = vcombine.low %v3748_v4, %v3747_v5  ;;  %2555 = vmatprep.subr.bf16.mxu0 %v3114_v38  ;;  %2579 = vmatprep.subr.bf16.mxu1 %v3114_v38  ;;  %s3337_s8 = scalar_lea.vmem %s3229_s26, %s2436_s7  ;;  %s3340_s9 = scalar_lea.vmem %s3234_s29, %s2436_s7  ;;  %v3749_v1 = vld [vmem:[#allocation9_spill] sm:$0xff]  ;;  %v3750_v0 = vld [vmem:[#allocation8_spill] sm:$0xff]  ;;  %v3751_v3 = vld [vmem:[#allocation11_spill] sm:$0xff]  ;;  %v3376_v54 = vcombine.low %v3257_v8, %v3259_v9  ;;  %v3385_v57 = vcombine.low %v3261_v10, %v3263_v11  ;;  %vm2185_vm2 = vcmask 519168  }
  0x55   : >> { %2559 = vmatprep.mubr.msk.bf16.mxu0 %vm3115_vm0, %v3114_v38  ;;  %v307_v40 = vld [vmem:[%s3340_s9] sm:$0xf]  ;;  %v308_v41 = vld [vmem:[%s3340_s9 + $0x4] sm:$0x3]  ;;  %2583 = vmatprep.mubr.msk.bf16.mxu1 %vm3115_vm0, %v3114_v38  ;;  %v3353_v45 = vcombine.low %v3750_v0, %v3749_v1  ;;  %v3399_v61 = vcombine.low %v3265_v12, %v3267_v13  ;;  %v3407_v63 = vcombine.low %v3269_v14, %v3271_v15  ;;  %s2446_s10 = sshll.u32 %s3108_s6, 3  ;;  %vm2187_vm3 = vcmask 517120  }
  0x56   : >> { %2556 = vmatpush3.bf16.msra.mxu0 %v3322_v37  ;;  %2580 = vmatpush3.bf16.msra.mxu1 %v3322_v37  ;;  %v2329_v42 = vcombine.low %v307_v40, %v308_v41  ;;  %v302_v43 = vld [vmem:[%s3337_s8] sm:$0xf]  ;;  %v304_v44 = vld [vmem:[%s3337_s8 + $0x4] sm:$0x7]  ;;  %v2348_v41 = vld [vmem:[%s3337_s8 + $0xc] sm:$0x3]  ;;  %v3525_v0 = vcombine.low %v3301_v30, %v3303_v31  ;;  %v3552_v5 = vcombine.low %v3309_v34, %v3311_v35  ;;  %s2184_s11 = scalar_lea.vmem %s3245_s16, %s2446_s10 }
  0x57   : >> { %2557 = vmatprep.subr.bf16.mxu0 %v3114_v38  ;;  %2581 = vmatprep.subr.bf16.mxu1 %v3114_v38  ;;  %v2337_v46 = vcombine.low %v302_v43, %v304_v44  ;;  %v3752_v2 = vld [vmem:[#allocation10_spill] sm:$0xff]  ;;  %v2349_v44 = vld [vmem:[%s3337_s8 + $0xc] sm:$0x7]  ;;  %s297_s6 = sadd.s32 1, %s3108_s6  }
  0x58   : >> { %v3361_v50 = vcombine.low %v3752_v2, %v3751_v3  ;;  %v303_v52 = vld [vmem:[%s3337_s8 + $0x4] sm:$0x3]  ;;  %v2380_v2 = vld [vmem:[%s3340_s9 + $0x14] sm:$0x7]  ;;  %p294_p5 = scmp.ge.s32.totalorder %s297_s6, 12  }
  0x59   : >> { %v437_v47 = vshrl.u32 %v2337_v46, 16  ;;  %v439_v48 = vshll.u32 %v2337_v46, 16  ;;  %v2333_v53 = vcombine.low %v302_v43, %v303_v52  ;;  %v309_v55 = vld [vmem:[%s3340_s9 + $0x4] sm:$0x7]  ;;  %v3425_v43 = vcombine.low %v3273_v16, %v3275_v17  ;;  %v2352_v46 = vld [vmem:[%s3340_s9 + $0x8] sm:$0xf] }
  0x5a   : >> { %2558 = vmatpush3.bf16.msra.mxu0 %v3330_v39  ;;  %2582 = vmatpush3.bf16.msra.mxu1 %v3330_v39  ;;  %v2343_v56 = vcombine.low %v307_v40, %v309_v55  ;;  %v2347_v40 = vld [vmem:[%s3337_s8 + $0x8] sm:$0xf] }
  0x5b   : >> { %2563 = vmatprep.subr.bf16.mxu0 %v3114_v38  ;;  %2587 = vmatprep.subr.bf16.mxu1 %v3114_v38  ;;  %v441_v49 = vrot.slane %v439_v48, 1  ;;  %v2363_v48 = vcombine.low %v2347_v40, %v2349_v44 }
  0x5c   : >> { %v589_v58 = vshll.u32 %v2343_v56, 16  ;;  %v587_v59 = vshrl.u32 %v2343_v56, 16 }
  0x5d   : >> { %2560 = vmatmul.mubr.msk.bf16.vlgmr.msra.gmra.mrb[0].mxu0 %vm327_vm1, %v2329_v42  ;;  %v442_v51 = vor.u32 %v441_v49, %v437_v47  ;;  %v2353_v47 = vld [vmem:[%s3340_s9 + $0xc] sm:$0x3]  ;;  %v783_v52 = vshll.u32 %v2363_v48, 16  ;;  %v781_v55 = vshrl.u32 %v2363_v48, 16  ;;  %v3492_v48 = vcombine.low %v3293_v26, %v3295_v27 }
  0x5e   : >> { %2564 = vmatpush3.bf16.msra.mxu0 %v3353_v45  ;;  %2567 = vmatprep.mubr.msk.bf16.mxu0 %vm3115_vm0, %v3114_v38  ;;  %v591_v60 = vrot.slane %v589_v58, 1  ;;  %v3435_v49 = vcombine.low %v2352_v46, %v2353_v47  ;;  %v2354_v58 = vld [vmem:[%s3340_s9 + $0xc] sm:$0x7] }
  0x5f   : >> { %2565 = vmatprep.subr.bf16.mxu0 %v3114_v38  ;;  %2584 = vmatmul.mubr.msk.bf16.vlgmr.msra.gmra.mrb[0].mxu1 %vm327_vm1, %v442_v51  ;;  %v785_v56 = vrot.slane %v783_v52, 1  ;;  %v2373_v52 = vld [vmem:[%s3337_s8 + $0x10] sm:$0xf] }
  0x60   : >> { %2588 = vmatpush3.bf16.msra.mxu1 %v3353_v45  ;;  %2591 = vmatprep.mubr.msk.bf16.mxu1 %vm3115_vm0, %v3114_v38  ;;  %v592_v62 = vor.u32 %v591_v60, %v587_v59  ;;  %v2369_v59 = vcombine.low %v2352_v46, %v2354_v58  ;;  %v3481_v46 = vcombine.low %v3289_v24, %v3291_v25 }
  0x61   : >> { %2589 = vmatprep.subr.bf16.mxu1 %v3114_v38  ;;  %v3462_v60 = vor.u32 %v785_v56, %v781_v55  ;;  %v2374_v55 = vld [vmem:[%s3337_s8 + $0x14] sm:$0x3]  ;;  %v3511_v58 = vcombine.low %v3297_v28, %v3299_v29 }
  0x62   : >> { %2566 = vmatpush3.bf16.msra.mxu0 %v3361_v50  ;;  %v3507_v56 = vcombine.low %v2373_v52, %v2374_v55 }
  0x63   : >> { %2571 = vmatprep.subr.bf16.mxu0 %v3114_v38 }
  0x64   : >> { %2590 = vmatpush3.bf16.msra.mxu1 %v3361_v50 }
  0x65   : >> { %2595 = vmatprep.subr.bf16.mxu1 %v3114_v38 }
  0x69   : >> { %2568 = vmatmul.mubr.msk.bf16.vlgmr.msra.gmra.mrb[0].mxu0 %vm327_vm1, %v2333_v53  ;;  %v3454_v53 = vcombine.low %v3281_v20, %v3283_v21 }
  0x6a   : >> { %2572 = vmatpush3.bf16.msra.mxu0 %v3376_v54  ;;  %2575 = vmatprep.mubr.msk.bf16.mxu0 %vm3115_vm0, %v3114_v38 }
  0x6b   : >> { %2573 = vmatprep.subr.bf16.mxu0 %v3114_v38  ;;  %2592 = vmatmul.mubr.msk.bf16.vlgmr.msra.gmra.mrb[0].mxu1 %vm327_vm1, %v2329_v42  ;;  %v3421_v42 = vcombine.low %v2347_v40, %v2348_v41  ;;  %v937_v40 = vshll.u32 %v2369_v59, 16  ;;  %v935_v41 = vshrl.u32 %v2369_v59, 16  ;;  %v2375_v59 = vld [vmem:[%s3337_s8 + $0x14] sm:$0x7] }
  0x6c   : >> { %2596 = vmatpush3.bf16.msra.mxu1 %v3376_v54  ;;  %2599 = vmatprep.mubr.msk.bf16.mxu1 %vm3115_vm0, %v3114_v38 }
  0x6d   : >> { %2597 = vmatprep.subr.bf16.mxu1 %v3114_v38  ;;  %v939_v44 = vrot.slane %v937_v40, 1  ;;  %v2378_v40 = vld [vmem:[%s3340_s9 + $0x10] sm:$0xf] }
  0x6e   : >> { %2574 = vmatpush3.bf16.msra.mxu0 %v3385_v57  ;;  %v2395_v3 = vcombine.low %v2378_v40, %v2380_v2 }
  0x6f   : >> { %2603 = vmatprep.subr.bf16.mxu0 %v3114_v38  ;;  %v3487_v47 = vor.u32 %v939_v44, %v935_v41  ;;  %v2379_v41 = vld [vmem:[%s3340_s9 + $0x14] sm:$0x3]  ;;  %v2389_v44 = vcombine.low %v2373_v52, %v2375_v59  ;;  %v3540_v59 = vcombine.low %v3305_v32, %v3307_v33 }
  0x70   : >> { %2598 = vmatpush3.bf16.msra.mxu1 %v3385_v57  ;;  %v3521_v55 = vcombine.low %v2378_v40, %v2379_v41 }
  0x71   : >> { %2627 = vmatprep.subr.bf16.mxu1 %v3114_v38  ;;  %v1131_v52 = vshll.u32 %v2389_v44, 16  ;;  %v1129_v41 = vshrl.u32 %v2389_v44, 16  ;;  %v1285_v44 = vshll.u32 %v2395_v3, 16 }
  0x73   : >> { %v1133_v1 = vrot.slane %v1131_v52, 1  ;;  %v1287_v2 = vrot.slane %v1285_v44, 1 }
  0x75   : >> { %2576 = vmatmul.mubr.msk.bf16.vlgmr.msra.gmra.mrb[0].mxu0 %vm327_vm1, %v442_v51  ;;  %v3439_v51 = vcombine.low %v3277_v18, %v3279_v19  ;;  %v3548_v4 = vor.u32 %v1133_v1, %v1129_v41  ;;  %v1283_v1 = vshrl.u32 %v2395_v3, 16  ;;  %v2412_v3 = vld [vmem:[%s3337_s8 + $0x18] sm:$0xf] }
  0x76   : >> { %2604 = vmatpush3.bf16.msra.mxu0 %v3399_v61  ;;  %2607 = vmatprep.mubr.msk.bf16.mxu0 %vm3115_vm0, %v3114_v38 }
  0x77   : >> { %2605 = vmatprep.subr.bf16.mxu0 %v3114_v38  ;;  %2600 = vmatmul.mubr.msk.bf16.vlgmr.msra.gmra.mrb[0].mxu1 %vm327_vm1, %v592_v62  ;;  %v3466_v62 = vcombine.low %v3285_v22, %v3287_v23  ;;  %v3570_v40 = vor.u32 %v1287_v2, %v1283_v1 }
  0x78   : >> { %2628 = vmatpush3.bf16.msra.mxu1 %v3399_v61  ;;  %2631 = vmatprep.mubr.msk.bf16.mxu1 %vm3115_vm0, %v3114_v38 }
  0x79   : >> { %2629 = vmatprep.subr.bf16.mxu1 %v3114_v38 }
  0x7a   : >> { %2606 = vmatpush3.bf16.msra.mxu0 %v3407_v63 }
  0x7b   : >> { %2611 = vmatprep.subr.bf16.mxu0 %v3114_v38 }
  0x7c   : >> { %2630 = vmatpush3.bf16.msra.mxu1 %v3407_v63 }
  0x7d   : >> { %2635 = vmatprep.subr.bf16.mxu1 %v3114_v38 }
  0x81   : >> { %2608 = vmatmul.mubr.msk.bf16.vlgmr.msra.gmra.mrb[0].mxu0 %vm327_vm1, %v3421_v42 }
  0x82   : >> { %2612 = vmatpush3.bf16.msra.mxu0 %v3425_v43  ;;  %2615 = vmatprep.mubr.msk.bf16.mxu0 %vm3115_vm0, %v3114_v38 }
  0x83   : >> { %2613 = vmatprep.subr.bf16.mxu0 %v3114_v38  ;;  %2632 = vmatmul.mubr.msk.bf16.vlgmr.msra.gmra.mrb[0].mxu1 %vm327_vm1, %v3435_v49 }
  0x84   : >> { %2636 = vmatpush3.bf16.msra.mxu1 %v3425_v43  ;;  %2639 = vmatprep.mubr.msk.bf16.mxu1 %vm3115_vm0, %v3114_v38 }
  0x85   : >> { %2637 = vmatprep.subr.bf16.mxu1 %v3114_v38 }
  0x86   : >> { %2614 = vmatpush3.bf16.msra.mxu0 %v3439_v51 }
  0x87   : >> { %2619 = vmatprep.subr.bf16.mxu0 %v3114_v38 }
  0x88   : >> { %2638 = vmatpush3.bf16.msra.mxu1 %v3439_v51 }
  0x89   : >> { %2643 = vmatprep.subr.bf16.mxu1 %v3114_v38 }
  0x8d   : >> { %2616 = vmatmul.mubr.msk.bf16.vlgmr.msra.gmra.mrb[0].mxu0 %vm327_vm1, %v3435_v49 }
  0x8e   : >> { %2620 = vmatpush3.bf16.msra.mxu0 %v3454_v53  ;;  %2623 = vmatprep.mubr.msk.bf16.mxu0 %vm3115_vm0, %v3114_v38 }
  0x8f   : >> { %2621 = vmatprep.subr.bf16.mxu0 %v3114_v38  ;;  %2640 = vmatmul.mubr.msk.bf16.vlgmr.msra.gmra.mrb[0].mxu1 %vm327_vm1, %v3462_v60 }
  0x90   : >> { %2644 = vmatpush3.bf16.msra.mxu1 %v3454_v53  ;;  %2647 = vmatprep.mubr.msk.bf16.mxu1 %vm3115_vm0, %v3114_v38 }
  0x91   : >> { %2645 = vmatprep.subr.bf16.mxu1 %v3114_v38 }
  0x92   : >> { %2622 = vmatpush3.bf16.msra.mxu0 %v3466_v62 }
  0x93   : >> { %2651 = vmatprep.subr.bf16.mxu0 %v3114_v38 }
  0x94   : >> { %2646 = vmatpush3.bf16.msra.mxu1 %v3466_v62 }
  0x95   : >> { %2675 = vmatprep.subr.bf16.mxu1 %v3114_v38 }
  0x99   : >> { %2624 = vmatmul.mubr.msk.bf16.vlgmr.msra.gmra.mrb[0].mxu0 %vm327_vm1, %v3462_v60 }
  0x9a   : >> { %2652 = vmatpush3.bf16.msra.mxu0 %v3481_v46  ;;  %2655 = vmatprep.mubr.msk.bf16.mxu0 %vm3115_vm0, %v3114_v38 }
  0x9b   : >> { %2653 = vmatprep.subr.bf16.mxu0 %v3114_v38  ;;  %2648 = vmatmul.mubr.msk.bf16.vlgmr.msra.gmra.mrb[0].mxu1 %vm327_vm1, %v3487_v47 }
  0x9c   : >> { %2676 = vmatpush3.bf16.msra.mxu1 %v3481_v46  ;;  %2679 = vmatprep.mubr.msk.bf16.mxu1 %vm3115_vm0, %v3114_v38 }
  0x9d   : >> { %2677 = vmatprep.subr.bf16.mxu1 %v3114_v38 }
  0x9e   : >> { %2654 = vmatpush3.bf16.msra.mxu0 %v3492_v48 }
  0x9f   : >> { %2659 = vmatprep.subr.bf16.mxu0 %v3114_v38 }
  0xa0   : >> { %2678 = vmatpush3.bf16.msra.mxu1 %v3492_v48 }
  0xa1   : >> { %2683 = vmatprep.subr.bf16.mxu1 %v3114_v38 }
  0xa5   : >> { %2656 = vmatmul.mubr.msk.bf16.vlgmr.msra.gmra.mrb[0].mxu0 %vm327_vm1, %v3507_v56 }
  0xa6   : >> { %2660 = vmatpush3.bf16.msra.mxu0 %v3511_v58  ;;  %2663 = vmatprep.mubr.msk.bf16.mxu0 %vm3115_vm0, %v3114_v38 }
  0xa7   : >> { %2661 = vmatprep.subr.bf16.mxu0 %v3114_v38  ;;  %2680 = vmatmul.mubr.msk.bf16.vlgmr.msra.gmra.mrb[0].mxu1 %vm327_vm1, %v3521_v55 }
  0xa8   : >> { %2684 = vmatpush3.bf16.msra.mxu1 %v3511_v58  ;;  %2687 = vmatprep.mubr.msk.bf16.mxu1 %vm3115_vm0, %v3114_v38 }
  0xa9   : >> { %2685 = vmatprep.subr.bf16.mxu1 %v3114_v38 }
  0xaa   : >> { %2662 = vmatpush3.bf16.msra.mxu0 %v3525_v0 }
  0xab   : >> { %2667 = vmatprep.subr.bf16.mxu0 %v3114_v38 }
  0xac   : >> { %2686 = vmatpush3.bf16.msra.mxu1 %v3525_v0 }
  0xad   : >> { %2691 = vmatprep.subr.bf16.mxu1 %v3114_v38 }
  0xb1   : >> { %2664 = vmatmul.mubr.msk.bf16.vlgmr.msra.gmra.mrb[0].mxu0 %vm327_vm1, %v3521_v55 }
  0xb2   : >> { %2668 = vmatpush3.bf16.msra.mxu0 %v3540_v59  ;;  %2671 = vmatprep.mubr.msk.bf16.mxu0 %vm3115_vm0, %v3114_v38 }
  0xb3   : >> { %2669 = vmatprep.subr.bf16.mxu0 %v3114_v38  ;;  %2688 = vmatmul.mubr.msk.bf16.vlgmr.msra.gmra.mrb[0].mxu1 %vm327_vm1, %v3548_v4 }
  0xb4   : >> { %2692 = vmatpush3.bf16.msra.mxu1 %v3540_v59  ;;  %2695 = vmatprep.mubr.msk.bf16.mxu1 %vm3115_vm0, %v3114_v38 }
  0xb5   : >> { %2693 = vmatprep.subr.bf16.mxu1 %v3114_v38 }
  0xb6   : >> { %2670 = vmatpush3.bf16.msra.mxu0 %v3552_v5 }
  0xb7   : >> { %2699 = vmatprep.subr.bf16.mxu0 %v3114_v38 }
  0xb8   : >> { %2694 = vmatpush3.bf16.msra.mxu1 %v3552_v5 }
  0xb9   : >> { %2723 = vmatprep.subr.bf16.mxu1 %v3114_v38 }
  0xbd   : >> { %2672 = vmatmul.mubr.msk.bf16.vlgmr.msra.gmra.mrb[0].mxu0 %vm327_vm1, %v3548_v4 }
  0xbe   : >> { %2700 = vmatpush3.bf16.msra.mxu0 %v3322_v37  ;;  %2703 = vmatprep.mubr.msk.bf16.mxu0 %vm3115_vm0, %v3114_v38 }
  0xbf   : >> { %2701 = vmatprep.subr.bf16.mxu0 %v3114_v38  ;;  %2696 = vmatmul.mubr.msk.bf16.vlgmr.msra.gmra.mrb[0].mxu1 %vm327_vm1, %v3570_v40 }
  0xc0   : >> { %2724 = vmatpush3.bf16.msra.mxu1 %v3322_v37  ;;  %2727 = vmatprep.mubr.msk.bf16.mxu1 %vm3115_vm0, %v3114_v38  ;;  %v2413_v37 = vld [vmem:[%s3337_s8 + $0x1c] sm:$0x3] }
  0xc1   : >> { %2725 = vmatprep.subr.bf16.mxu1 %v3114_v38 }
  0xc2   : >> { %2702 = vmatpush3.bf16.msra.mxu0 %v3330_v39 }
  0xc3   : >> { %2707 = vmatprep.subr.bf16.mxu0 %v3114_v38 }
  0xc4   : >> { %2726 = vmatpush3.bf16.msra.mxu1 %v3330_v39  ;;  %v2414_v39 = vld [vmem:[%s3337_s8 + $0x1c] sm:$0x7] }
  0xc5   : >> { %2704 = vmatmul.mubr.msk.bf16.vlgmr.msra.gmra.mrb[4].mxu0 %vm327_vm1, %v3435_v49  ;;  %2731 = vmatprep.subr.bf16.mxu1 %v3114_v38 }
  0xc6   : >> { %2708 = vmatpush3.bf16.msra.mxu0 %v3353_v45  ;;  %2711 = vmatprep.mubr.msk.bf16.mxu0 %vm3115_vm0, %v3114_v38 }
  0xc7   : >> { %2709 = vmatprep.subr.bf16.mxu0 %v3114_v38  ;;  %2728 = vmatmul.mubr.msk.bf16.vlgmr.msra.gmra.mrb[4].mxu1 %vm327_vm1, %v3462_v60 }
  0xc8   : >> { %2732 = vmatpush3.bf16.msra.mxu1 %v3353_v45  ;;  %2735 = vmatprep.mubr.msk.bf16.mxu1 %vm3115_vm0, %v3114_v38  ;;  %v2417_v45 = vld [vmem:[%s3340_s9 + $0x18] sm:$0xf] }
  0xc9   : >> { %2733 = vmatprep.subr.bf16.mxu1 %v3114_v38 }
  0xca   : >> { %2710 = vmatpush3.bf16.msra.mxu0 %v3361_v50 }
  0xcb   : >> { %2715 = vmatprep.subr.bf16.mxu0 %v3114_v38 }
  0xcc   : >> { %2734 = vmatpush3.bf16.msra.mxu1 %v3361_v50  ;;  %v2418_v50 = vld [vmem:[%s3340_s9 + $0x1c] sm:$0x3] }
  0xcd   : >> { %2739 = vmatprep.subr.bf16.mxu1 %v3114_v38 }
  0xd1   : >> { %2712 = vmatmul.mubr.msk.bf16.vlgmr.msra.gmra.mrb[4].mxu0 %vm327_vm1, %v3421_v42 }
  0xd2   : >> { %2716 = vmatpush3.bf16.msra.mxu0 %v3376_v54  ;;  %2719 = vmatprep.mubr.msk.bf16.mxu0 %vm3115_vm0, %v3114_v38 }
  0xd3   : >> { %2717 = vmatprep.subr.bf16.mxu0 %v3114_v38  ;;  %2736 = vmatmul.mubr.msk.bf16.vlgmr.msra.gmra.mrb[4].mxu1 %vm327_vm1, %v3435_v49 }
  0xd4   : >> { %2740 = vmatpush3.bf16.msra.mxu1 %v3376_v54  ;;  %2743 = vmatprep.mubr.msk.bf16.mxu1 %vm3115_vm0, %v3114_v38  ;;  %v2424_v54 = vcombine.low %v2412_v3, %v2414_v39 }
  0xd5   : >> { %2741 = vmatprep.subr.bf16.mxu1 %v3114_v38 }
  0xd6   : >> { %2718 = vmatpush3.bf16.msra.mxu0 %v3385_v57 }
  0xd7   : >> { %2747 = vmatprep.subr.bf16.mxu0 %v3114_v38 }
  0xd8   : >> { %2742 = vmatpush3.bf16.msra.mxu1 %v3385_v57  ;;  %v2422_v57 = vcombine.low %v2417_v45, %v2418_v50 }
  0xd9   : >> { %2771 = vmatprep.subr.bf16.mxu1 %v3114_v38 }
  0xdd   : >> { %2720 = vmatmul.mubr.msk.bf16.vlgmr.msra.gmra.mrb[4].mxu0 %vm327_vm1, %v3462_v60 }
  0xde   : >> { %2748 = vmatpush3.bf16.msra.mxu0 %v3399_v61  ;;  %2751 = vmatprep.mubr.msk.bf16.mxu0 %vm3115_vm0, %v3114_v38 }
  0xdf   : >> { %2749 = vmatprep.subr.bf16.mxu0 %v3114_v38  ;;  %2744 = vmatmul.mubr.msk.bf16.vlgmr.msra.gmra.mrb[4].mxu1 %vm327_vm1, %v3487_v47 }
  0xe0   : >> { %2772 = vmatpush3.bf16.msra.mxu1 %v3399_v61  ;;  %2775 = vmatprep.mubr.msk.bf16.mxu1 %vm3115_vm0, %v3114_v38  ;;  %v1975_v61 = vshll.u32 %v2424_v54, 16 }
  0xe1   : >> { %2773 = vmatprep.subr.bf16.mxu1 %v3114_v38 }
  0xe2   : >> { %2750 = vmatpush3.bf16.msra.mxu0 %v3407_v63  ;;  %v1977_v42 = vrot.slane %v1975_v61, 1 }
  0xe3   : >> { %2755 = vmatprep.subr.bf16.mxu0 %v3114_v38 }
  0xe4   : >> { %2774 = vmatpush3.bf16.msra.mxu1 %v3407_v63  ;;  %v1973_v63 = vshrl.u32 %v2424_v54, 16 }
  0xe5   : >> { %2779 = vmatprep.subr.bf16.mxu1 %v3114_v38 }
  0xe9   : >> { %2752 = vmatmul.mubr.msk.bf16.vlgmr.msra.gmra.mrb[4].mxu0 %vm327_vm1, %v3507_v56 }
  0xea   : >> { %2756 = vmatpush3.bf16.msra.mxu0 %v3425_v43  ;;  %2759 = vmatprep.mubr.msk.bf16.mxu0 %vm3115_vm0, %v3114_v38 }
  0xeb   : >> { %2757 = vmatprep.subr.bf16.mxu0 %v3114_v38  ;;  %2776 = vmatmul.mubr.msk.bf16.vlgmr.msra.gmra.mrb[4].mxu1 %vm327_vm1, %v3521_v55 }
  0xec   : >> { %2780 = vmatpush3.bf16.msra.mxu1 %v3425_v43  ;;  %2783 = vmatprep.mubr.msk.bf16.mxu1 %vm3115_vm0, %v3114_v38  ;;  %v2419_v43 = vld [vmem:[%s3340_s9 + $0x1c] sm:$0x7] }
  0xed   : >> { %2781 = vmatprep.subr.bf16.mxu1 %v3114_v38  ;;  %v2428_v49 = vcombine.low %v2417_v45, %v2419_v43 }
  0xee   : >> { %2758 = vmatpush3.bf16.msra.mxu0 %v3439_v51 }
  0xef   : >> { %2763 = vmatprep.subr.bf16.mxu0 %v3114_v38 }
  0xf0   : >> { %2782 = vmatpush3.bf16.msra.mxu1 %v3439_v51  ;;  %v1978_v51 = vor.u32 %v1977_v42, %v1973_v63 }
  0xf1   : >> { %2787 = vmatprep.subr.bf16.mxu1 %v3114_v38 }
  0xf5   : >> { %2760 = vmatmul.mubr.msk.bf16.vlgmr.msra.gmra.mrb[4].mxu0 %vm327_vm1, %v3521_v55 }
  0xf6   : >> { %2764 = vmatpush3.bf16.msra.mxu0 %v3454_v53  ;;  %2767 = vmatprep.mubr.msk.bf16.mxu0 %vm3115_vm0, %v3114_v38 }
  0xf7   : >> { %2765 = vmatprep.subr.bf16.mxu0 %v3114_v38  ;;  %2784 = vmatmul.mubr.msk.bf16.vlgmr.msra.gmra.mrb[4].mxu1 %vm327_vm1, %v3548_v4 }
  0xf8   : >> { %2788 = vmatpush3.bf16.msra.mxu1 %v3454_v53  ;;  %2791 = vmatprep.mubr.msk.bf16.mxu1 %vm3115_vm0, %v3114_v38  ;;  %v2117_v53 = vshll.u32 %v2428_v49, 16 }
  0xf9   : >> { %2789 = vmatprep.subr.bf16.mxu1 %v3114_v38 }
  0xfa   : >> { %2766 = vmatpush3.bf16.msra.mxu0 %v3466_v62  ;;  %v2119_v60 = vrot.slane %v2117_v53, 1 }
  0xfb   : >> { %2795 = vmatprep.subr.bf16.mxu0 %v3114_v38 }
  0xfc   : >> { %2790 = vmatpush3.bf16.msra.mxu1 %v3466_v62 }
  0xfd   : >> { %2819 = vmatprep.subr.bf16.mxu1 %v3114_v38 }
 0x101   : >> { %2768 = vmatmul.mubr.msk.bf16.vlgmr.msra.gmra.mrb[4].mxu0 %vm327_vm1, %v3548_v4  ;;  %v2420_v4 = vcombine.low %v2412_v3, %v2413_v37 }
 0x102   : >> { %2796 = vmatpush3.bf16.msra.mxu0 %v3481_v46  ;;  %2799 = vmatprep.mubr.msk.bf16.mxu0 %vm3115_vm0, %v3114_v38 }
 0x103   : >> { %2797 = vmatprep.subr.bf16.mxu0 %v3114_v38  ;;  %2792 = vmatmul.mubr.msk.bf16.vlgmr.msra.gmra.mrb[4].mxu1 %vm327_vm1, %v3570_v40 }
 0x104   : >> { %2820 = vmatpush3.bf16.msra.mxu1 %v3481_v46  ;;  %2823 = vmatprep.mubr.msk.bf16.mxu1 %vm3115_vm0, %v3114_v38 }
 0x105   : >> { %2821 = vmatprep.subr.bf16.mxu1 %v3114_v38 }
 0x106   : >> { %2798 = vmatpush3.bf16.msra.mxu0 %v3492_v48 }
 0x107   : >> { %2803 = vmatprep.subr.bf16.mxu0 %v3114_v38 }
 0x108   : >> { %2822 = vmatpush3.bf16.msra.mxu1 %v3492_v48 }
 0x109   : >> { %2827 = vmatprep.subr.bf16.mxu1 %v3114_v38 }
 0x10d   : >> { %2800 = vmatmul.mubr.msk.bf16.vlgmr.msra.gmra.mrb[4].mxu0 %vm327_vm1, %v2420_v4 }
 0x10e   : >> { %2804 = vmatpush3.bf16.msra.mxu0 %v3511_v58  ;;  %2807 = vmatprep.mubr.msk.bf16.mxu0 %vm3115_vm0, %v3114_v38 }
 0x10f   : >> { %2805 = vmatprep.subr.bf16.mxu0 %v3114_v38  ;;  %2824 = vmatmul.mubr.msk.bf16.vlgmr.msra.gmra.mrb[4].mxu1 %vm327_vm1, %v2422_v57 }
 0x110   : >> { %2828 = vmatpush3.bf16.msra.mxu1 %v3511_v58  ;;  %2831 = vmatprep.mubr.msk.bf16.mxu1 %vm3115_vm0, %v3114_v38 }
 0x111   : >> { %2829 = vmatprep.subr.bf16.mxu1 %v3114_v38 }
 0x112   : >> { %2806 = vmatpush3.bf16.msra.mxu0 %v3525_v0 }
 0x113   : >> { %2811 = vmatprep.subr.bf16.mxu0 %v3114_v38 }
 0x114   : >> { %2830 = vmatpush3.bf16.msra.mxu1 %v3525_v0  ;;  %v2115_v0 = vshrl.u32 %v2428_v49, 16 }
 0x115   : >> { %2835 = vmatprep.subr.bf16.mxu1 %v3114_v38 }
 0x116   : >> { %v2120_v62 = vor.u32 %v2119_v60, %v2115_v0 }
 0x119   : >> { %2808 = vmatmul.mubr.msk.bf16.vlgmr.msra.gmra.mrb[4].mxu0 %vm327_vm1, %v2422_v57 }
 0x11a   : >> { %2812 = vmatpush3.bf16.msra.mxu0 %v3540_v59  ;;  %2815 = vmatprep.mubr.msk.bf16.mxu0 %vm3115_vm0, %v3114_v38 }
 0x11b   : >> { %2813 = vmatprep.subr.bf16.mxu0 %v3114_v38  ;;  %2832 = vmatmul.mubr.msk.bf16.vlgmr.msra.gmra.mrb[4].mxu1 %vm327_vm1, %v1978_v51 }
 0x11c   : >> { %2836 = vmatpush3.bf16.msra.mxu1 %v3540_v59  ;;  %2839 = vmatprep.mubr.msk.bf16.mxu1 %vm3115_vm0, %v3114_v38 }
 0x11d   : >> { %2837 = vmatprep.subr.bf16.mxu1 %v3114_v38 }
 0x11e   : >> { %2814 = vmatpush3.bf16.msra.mxu0 %v3552_v5 }
 0x120   : >> { %2838 = vmatpush3.bf16.msra.mxu1 %v3552_v5 }
 0x125   : >> { %2816 = vmatmul.mubr.msk.bf16.vlgmr.msra.gmra.mrb[4].mxu0 %vm327_vm1, %v1978_v51 }
 0x127   : >> { %2840 = vmatmul.mubr.msk.bf16.vlgmr.msra.gmra.mrb[4].mxu1 %vm327_vm1, %v2120_v62 }
 0x190   : >> { %v1184_v46 = vpop.f32.mrb[0].mxu0 }
 0x191   : >> { %v2673_v47 = vpop.f32.mrb[1].mxu0 }
 0x192   : >> { %v1187_v48 = vpop.f32.mrb[2].mxu0  ;;  %v1326_v58 = vpop.f32.mrb[0].mxu1 }
 0x193   : >> { %v2674_v56 = vpop.f32.mrb[3].mxu0  ;;  %v1335_v55 = vmax.f32 %v1184_v46, %v1326_v58  ;;  %v2697_v52 = vpop.f32.mrb[1].mxu1 }
 0x194   : >> { %v1329_v59 = vpop.f32.mrb[2].mxu1 }
 0x195   : >> { %v1336_v41 = vmax.f32 %v1187_v48, %v1329_v59  ;;  %v2698_v44 = vpop.f32.mrb[3].mxu1  ;;  %v1343_v3 = vadd.f32 %v3313_v36, %v1335_v55 }
 0x197   : >> { %v1344_v45 = vadd.f32 %v3313_v36, %v1336_v41  ;;  %v1345_v61 = vmax.f32 %v1343_v3, 0.0 }
 0x199   : >> { %v1346_v43 = vmax.f32 %v1344_v45, 0.0 }
 0x1f8   : >> { %v2016_v38 = vpop.f32.mrb[4].mxu0 }
 0x1f9   : >> { %v2817_v1 = vpop.f32.mrb[5].mxu0 }
 0x1fa   : >> { %v2019_v2 = vpop.f32.mrb[6].mxu0  ;;  %v2158_v40 = vpop.f32.mrb[4].mxu1 }
 0x1fb   : >> { %v2818_v5 = vpop.f32.mrb[7].mxu0  ;;  %v2167_v37 = vmax.f32 %v2016_v38, %v2158_v40  ;;  %v2841_v4 = vpop.f32.mrb[5].mxu1 }
 0x1fc   : >> { %v2161_v39 = vpop.f32.mrb[6].mxu1 }
 0x1fd   : >> { %v2169_v50 = vadd.f32 %v3313_v36, %v2167_v37  ;;  %v2168_v54 = vmax.f32 %v2019_v2, %v2161_v39  ;;  %v2842_v57 = vpop.f32.mrb[7].mxu1 }
 0x1ff   : >> { %v2171_v63 = vmax.f32 %v2169_v50, 0.0  ;;  %v2170_v42 = vadd.f32 %v3313_v36, %v2168_v54 }
 0x201   : >> { %v2173_v49 = vmax.f32 %v1345_v61, %v2171_v63  ;;  %v2172_v51 = vmax.f32 %v2170_v42, 0.0  ;;  %296 = sbr.rel (!%p294_p5) target bundleno = 83 (0x53), region = 102 }
 0x203   : >> { %v2444_v53 = vpack.c.bf16 %v2173_v49, %v2173_v49  ;;  %v2174_v0 = vmax.f32 %v1346_v43, %v2172_v51 }
 0x205   : >> { %2186 = vst.msk [vmem:[%s2184_s11] sm:$0xf] %vm2185_vm2, %v2444_v53  ;;  %v2445_v60 = vpack.c.bf16 %v2174_v0, %v2174_v0 }
 0x207   : >> { %2188 = vst.msk [vmem:[%s2184_s11 + $0x4] sm:$0x3] %vm2187_vm3, %v2445_v60 }
 0x208 PF: > { %s16_s15 = sadd.s32 1, %s3104_s15  }
 0x209   : > { %p13_p10 = scmp.ge.s32.totalorder %s16_s15, 4  }
 0x20b   :  { %15 = sbr.rel (!%p13_p10) target bundleno = 2 (0x2), region = 113 }
 0x212   :  { %2210 = vsyncpa [#allocation3], 1 }
 0x213   :  { %2212 = vsyncpa [#allocation3 + $0x1], 1 }
 0x214   :  { %2213 = vsyncpa [#allocation5], 1 }

// kernel: net_forward.5
= control target key start
LH: loop header
LB: loop body
LE: loop exit
PB: predicated region body
PF: predicated region fallthrough
CT: control target
= control target key end

     0   :  { %10 = vsyncpa [#allocation4], 0  ;;  %s1791_s18 = smov 0   ;;  %s1793_s19 = smov 0   ;;  %s1981_s0 = inlined_call_operand.vmem [shape: bf16[2,9216], index: 0, kind: input, shape index: {}]   ;;  %s1982_s1 = inlined_call_operand.vmem [shape: bf16[9216,128], index: 1, kind: input, shape index: {}]   ;;  %s1983_s2 = inlined_call_operand.vmem [shape: f32[1,128], index: 2, kind: input, shape index: {}]   ;;  %s1984_s3 = inlined_call_operand.vmem [shape: bf16[128,128], index: 3, kind: input, shape index: {}]   ;;  %s1985_s4 = inlined_call_operand.vmem [shape: f32[1,128], index: 4, kind: input, shape index: {}]   ;;  %s1986_s5 = inlined_call_operand.hbm [shape: f32[2,128], index: 5, kind: output, shape index: {}]  }
   0x1   :  { %s1795_s20 = smov 0  }
   0x2 LB: > { %s1338_s21 = sadd.s32 4294967295, %s1752_s20   ;;  %s25_s22 = sadd.s32 1, %s1748_s19  ;;  %s1752_s20 = sphi %s1795_s20, %s16_s20   ;;  %s1748_s19 = sphi %s1793_s19, %s1989_s19   ;;  %s1744_s18 = sphi %s1791_s18, %s1988_s18  }
   0x3   : > { %p26_p0 = scmp.ge.s32.totalorder %s25_s22, 8  ;;  %p1341_p1 = scmp.ge.s32.totalorder %s1752_s20, 1 }
   0x4   : > { %p217_p2 = scmp.lt.s32.totalorder %s1752_s20, 9 }
   0x5   : > { %s1991_s22 = smov (%p26_p0, %s25_s22), 0 }
   0x6   : > { %p218_p3 = pnand %p1341_p1, %p217_p2 }
   0x7   : > { %s248_s23 = smul.u32 (!%p218_p3), 9, %s1744_s18  ;;  %p1343_p6 = scmp.ne.s32.totalorder (!%p218_p3), %s1744_s18, 0 }
   0x8   : > { %221 = sbr.rel (%p218_p3) target bundleno = 908 (0x38c), region = 40 }
   0x9   : > { %s257_s24 = smul.u32 (!%p218_p3), 144, %s1744_s18  ;;  %p251_p4 = scmp.lt.s32.totalorder (!%p218_p3), %s248_s23, 71 }
   0xb   : > { %p258_p5 = scmp.lt.s32.totalorder (!%p218_p3), %s257_s24, 1151 }
   0xf   : > { %s1993_s23 = smov (!%p251_p4, %s248_s23), 71  ;;  %s1995_s24 = smov (!%p258_p5, %s257_s24), 1151 }
  0x10   : > { %s1817_s27 = scalar_lea.vmem %s1981_s0, %s1993_s23  ;;  %s1342_s28 = sshll.u32 %s1995_s24, 2  ;;  %v1754_v0 = vmov (!%p1343_p6), 0.0  }
  0x11   : > { %s1822_s6 = scalar_lea.vmem %s1982_s1, %s1342_s28  ;;  %267 = sbr.rel (%p1343_p6) target bundleno = 24 (0x18), region = 44  ;;  %268 = vst [vmem:[#allocation2] sm:$0x3] (!%p1343_p6), %v1754_v0 }
  0x18 PF: > { %v1615_v1 = vld [vmem:[%s1822_s6 + $0x40] sm:$0xff]   ;;  %v1619_v5 = vld [vmem:[%s1822_s6 + $0x48] sm:$0xff]   ;;  %v1623_v9 = vld [vmem:[%s1822_s6 + $0x50] sm:$0xff]   ;;  %v422_v30 = vlaneseq  ;;  %v1755_v36 = vmov 1966171168   ;;  %vm1757_vm0 = vmmov 0  }
  0x19   : > { %v1616_v2 = vld [vmem:[%s1822_s6 + $0xc0] sm:$0xff]   ;;  %1432 = vmatprep.subr.bf16.mxu0 %v1615_v1  ;;  %v1620_v6 = vld [vmem:[%s1822_s6 + $0xc8] sm:$0xff]   ;;  %v1624_v10 = vld [vmem:[%s1822_s6 + $0xd0] sm:$0xff]   ;;  %v420_v37 = vunpack.c.l.s4 %v1755_v36  ;;  %p1417_p7 = scmp.ne.s32.totalorder %s1744_s18, 7 }
  0x1a   : > { %v1617_v3 = vld [vmem:[%s1822_s6] sm:$0xff]   ;;  %1454 = vmatprep.subr.bf16.mxu1 %v1616_v2  ;;  %v1621_v7 = vld [vmem:[%s1822_s6 + $0x8] sm:$0xff]   ;;  %v1625_v11 = vld [vmem:[%s1822_s6 + $0x10] sm:$0xff]   ;;  %v423_v34 = vshrl.u32 %v422_v30, 7  ;;  %vm1759_vm1 = vmmov (!%p1417_p7), 0   ;;  %vm1250_vm2 = vcmask (!%p1417_p7), 1041408  }
  0x1b   : > { %v1618_v4 = vld [vmem:[%s1822_s6 + $0x80] sm:$0xff]   ;;  %1433 = vmatpush3.bf16.msra.mxu0 %v1617_v3  ;;  %v1622_v8 = vld [vmem:[%s1822_s6 + $0x88] sm:$0xff]   ;;  %v1626_v12 = vld [vmem:[%s1822_s6 + $0x90] sm:$0xff]   ;;  %v421_v40 = vunpack.c.0.s8 %v420_v37 }
  0x1c   : > { %1455 = vmatpush3.bf16.msra.mxu1 %v1618_v4  ;;  %1434 = vmatprep.subr.bf16.mxu0 %v1619_v5  ;;  %v1627_v13 = vld [vmem:[%s1822_s6 + $0x58] sm:$0xff]   ;;  %v1631_v17 = vld [vmem:[%s1822_s6 + $0x60] sm:$0xff]   ;;  %v1635_v21 = vld [vmem:[%s1822_s6 + $0x68] sm:$0xff]  }
  0x1d   : > { %1456 = vmatprep.subr.bf16.mxu1 %v1620_v6  ;;  %v1628_v14 = vld [vmem:[%s1822_s6 + $0xd8] sm:$0xff]   ;;  %v1632_v18 = vld [vmem:[%s1822_s6 + $0xe0] sm:$0xff]   ;;  %v1636_v22 = vld [vmem:[%s1822_s6 + $0xe8] sm:$0xff]   ;;  %v1860_v42 = vsub.s32 %v421_v40, %v423_v34 }
  0x1e   : > { %v1629_v15 = vld [vmem:[%s1822_s6 + $0x18] sm:$0xff]   ;;  %v1633_v19 = vld [vmem:[%s1822_s6 + $0x20] sm:$0xff]   ;;  %v1637_v23 = vld [vmem:[%s1822_s6 + $0x28] sm:$0xff]  }
  0x1f   : > { %1435 = vmatpush3.bf16.msra.mxu0 %v1621_v7  ;;  %v1630_v16 = vld [vmem:[%s1822_s6 + $0x98] sm:$0xff]   ;;  %v1634_v20 = vld [vmem:[%s1822_s6 + $0xa0] sm:$0xff]   ;;  %v1638_v24 = vld [vmem:[%s1822_s6 + $0xa8] sm:$0xff]  }
  0x20   : > { %1457 = vmatpush3.bf16.msra.mxu1 %v1622_v8  ;;  %1436 = vmatprep.subr.bf16.mxu0 %v1623_v9  ;;  %v1639_v25 = vld [vmem:[%s1822_s6 + $0x70] sm:$0xff]   ;;  %v1643_v29 = vld [vmem:[%s1822_s6 + $0x78] sm:$0xff]   ;;  %v1648_v35 = vld [vmem:[%s1822_s6 + $0x140] sm:$0xff]  }
  0x21   : > { %1458 = vmatprep.subr.bf16.mxu1 %v1624_v10  ;;  %v1640_v26 = vld [vmem:[%s1822_s6 + $0xf0] sm:$0xff]   ;;  %v1644_v31 = vld [vmem:[%s1822_s6 + $0xf8] sm:$0xff]   ;;  %v270_v38 = vld [vmem:[%s1817_s27] sm:$0xff] }
  0x22   : > { %v1641_v27 = vld [vmem:[%s1822_s6 + $0x30] sm:$0xff]   ;;  %v1645_v32 = vld [vmem:[%s1822_s6 + $0x38] sm:$0xff]   ;;  %v418_v39 = vcombine.high %v270_v38, %v270_v38  ;;  %v1650_v41 = vld [vmem:[%s1822_s6 + $0x1c0] sm:$0xff]   ;;  %v425_v43 = vrot.slane %v270_v38, %v1860_v42 }
  0x23   : > { %1437 = vmatpush3.bf16.msra.mxu0 %v1625_v11  ;;  %v1642_v28 = vld [vmem:[%s1822_s6 + $0xb0] sm:$0xff]   ;;  %v1646_v33 = vld [vmem:[%s1822_s6 + $0xb8] sm:$0xff]   ;;  %v1649_v49 = vld [vmem:[%s1822_s6 + $0x100] sm:$0xff]  }
  0x24   : > { %1459 = vmatpush3.bf16.msra.mxu1 %v1626_v12  ;;  %1438 = vmatprep.subr.bf16.mxu0 %v1627_v13  ;;  %v1864_v44 = vrot.slane %v418_v39, %v1860_v42  ;;  %v433_v45 = vcombine.high %v425_v43, %v425_v43  ;;  %v441_v46 = vrot.slane %v425_v43, %v1860_v42  ;;  %v1652_v52 = vld [vmem:[%s1822_s6 + $0x148] sm:$0xff]   ;;  %v1651_v54 = vld [vmem:[%s1822_s6 + $0x180] sm:$0xff]   ;;  %v1656_v58 = vld [vmem:[%s1822_s6 + $0x150] sm:$0xff]  }
  0x25   : > { %1460 = vmatprep.subr.bf16.mxu1 %v1628_v14  ;;  %v1654_v55 = vld [vmem:[%s1822_s6 + $0x1c8] sm:$0xff]   ;;  %v1658_v60 = vld [vmem:[%s1822_s6 + $0x1d0] sm:$0xff]   ;;  %v1660_v62 = vld [vmem:[%s1822_s6 + $0x158] sm:$0xff]  }
  0x26   : > { %v434_v47 = vcombine.high %v1864_v44, %v1864_v44  ;;  %v455_v48 = vrot.slane %v433_v45, %v1860_v42  ;;  %v463_v51 = vcombine.high %v441_v46, %v441_v46  ;;  %v1653_v57 = vld [vmem:[%s1822_s6 + $0x108] sm:$0xff]   ;;  %v1657_v61 = vld [vmem:[%s1822_s6 + $0x110] sm:$0xff]   ;;  %v1662_v0 = vld [vmem:[%s1822_s6 + $0x1d8] sm:$0xff]  }
  0x27   : > { %1439 = vmatpush3.bf16.msra.mxu0 %v1629_v15  ;;  %v1655_v59 = vld [vmem:[%s1822_s6 + $0x188] sm:$0xff]   ;;  %v1659_v63 = vld [vmem:[%s1822_s6 + $0x190] sm:$0xff]   ;;  %v1661_v1 = vld [vmem:[%s1822_s6 + $0x118] sm:$0xff]  }
  0x28   : > { %1461 = vmatpush3.bf16.msra.mxu1 %v1630_v16  ;;  %1440 = vmatprep.subr.bf16.mxu0 %v1631_v17  ;;  %v462_v50 = vrot.slane %v434_v47, %v1860_v42  ;;  %v465_v53 = vcombine.high %v455_v48, %v455_v48  ;;  %v1664_v2 = vld [vmem:[%s1822_s6 + $0x160] sm:$0xff]   ;;  %v1663_v3 = vld [vmem:[%s1822_s6 + $0x198] sm:$0xff]   ;;  %v1668_v6 = vld [vmem:[%s1822_s6 + $0x168] sm:$0xff]  }
  0x29   : > { %1462 = vmatprep.subr.bf16.mxu1 %v1632_v18  ;;  %954 = vmatprep.mubr.bf16.mxu0 %v455_v48  ;;  %v1666_v4 = vld [vmem:[%s1822_s6 + $0x1e0] sm:$0xff]   ;;  %v1670_v8 = vld [vmem:[%s1822_s6 + $0x1e8] sm:$0xff]   ;;  %v1672_v10 = vld [vmem:[%s1822_s6 + $0x170] sm:$0xff]   ;;  %v448_v18 = vrot.slane %v1864_v44, %v1860_v42 }
  0x2a   : > { %v466_v56 = vcombine.high %v462_v50, %v462_v50  ;;  %994 = vmatprep.mubr.bf16.mxu1 %v465_v53  ;;  %v1665_v5 = vld [vmem:[%s1822_s6 + $0x120] sm:$0xff]   ;;  %v1669_v9 = vld [vmem:[%s1822_s6 + $0x128] sm:$0xff]   ;;  %v1674_v12 = vld [vmem:[%s1822_s6 + $0x1f0] sm:$0xff]  }
  0x2b   : > { %1441 = vmatpush3.bf16.msra.mxu0 %v1633_v19  ;;  %v1667_v7 = vld [vmem:[%s1822_s6 + $0x1a0] sm:$0xff]   ;;  %v1671_v11 = vld [vmem:[%s1822_s6 + $0x1a8] sm:$0xff]   ;;  %v1673_v13 = vld [vmem:[%s1822_s6 + $0x130] sm:$0xff]  }
  0x2c   : > { %1463 = vmatpush3.bf16.msra.mxu1 %v1634_v20  ;;  %1442 = vmatprep.subr.bf16.mxu0 %v1635_v21  ;;  %v1676_v14 = vld [vmem:[%s1822_s6 + $0x178] sm:$0xff]   ;;  %v1675_v15 = vld [vmem:[%s1822_s6 + $0x1b0] sm:$0xff]   ;;  %v1680_v20 = vld [vmem:[%s1822_s6 + $0x200] sm:$0xff]   ;;  %v1756_v21 = vmov 0.0  }
  0x2d   : > { %1464 = vmatprep.subr.bf16.mxu1 %v1636_v22  ;;  %v1678_v16 = vld [vmem:[%s1822_s6 + $0x1f8] sm:$0xff]   ;;  %v464_v22 = vcombine.high %v448_v18, %v448_v18  ;;  %v1344_v30 = vld.sshfl [vmem:[%s1817_s27 + $0x8] sm:$0x1 pattern:$0x75316420] }
  0x2e   : > { %v1677_v17 = vld [vmem:[%s1822_s6 + $0x138] sm:$0xff]  }
  0x2f   : > { %1443 = vmatpush3.bf16.msra.mxu0 %v1637_v23  ;;  %v1679_v19 = vld [vmem:[%s1822_s6 + $0x1b8] sm:$0xff]   ;;  %v1681_v23 = vld [vmem:[%s1822_s6 + $0x208] sm:$0xff]  }
  0x30   : > { %1465 = vmatpush3.bf16.msra.mxu1 %v1638_v24  ;;  %1444 = vmatprep.subr.bf16.mxu0 %v1639_v25  ;;  %v1682_v24 = vld [vmem:[%s1822_s6 + $0x210] sm:$0xff]   ;;  %v1683_v25 = vld [vmem:[%s1822_s6 + $0x218] sm:$0xff]  }
  0x31   : > { %1466 = vmatprep.subr.bf16.mxu1 %v1640_v26  ;;  %v1684_v26 = vld [vmem:[%s1822_s6 + $0x220] sm:$0xff]  }
  0x33   : > { %1445 = vmatpush3.bf16.msra.mxu0 %v1641_v27  ;;  %v1685_v27 = vld [vmem:[%s1822_s6 + $0x228] sm:$0xff]  }
  0x34   : > { %1467 = vmatpush3.bf16.msra.mxu1 %v1642_v28  ;;  %1446 = vmatprep.subr.bf16.mxu0 %v1643_v29  ;;  %v1686_v28 = vld [vmem:[%s1822_s6 + $0x230] sm:$0xff]   ;;  %v1687_v29 = vld [vmem:[%s1822_s6 + $0x238] sm:$0xff]  }
  0x35   : > { %1468 = vmatprep.subr.bf16.mxu1 %v1644_v31  ;;  %v480_v31 = vrot.slane %v1344_v30, %v1860_v42 }
  0x37   : > { %1447 = vmatpush3.bf16.msra.mxu0 %v1645_v32 }
  0x38   : > { %1469 = vmatpush3.bf16.msra.mxu1 %v1646_v33  ;;  %1476 = vmatprep.subr.bf16.mxu0 %v1648_v35 }
  0x39   : > { %1498 = vmatprep.subr.bf16.mxu1 %v1650_v41 }
  0x3a   : > { %955 = vmatmul.mubr.bf16.vlgmr.msra.gmra.mrb[0].mxu0 %v441_v46 }
  0x3b   : > { %1477 = vmatpush3.bf16.msra.mxu0 %v1649_v49  ;;  %995 = vmatmul.mubr.bf16.vlgmr.msra.gmra.mrb[0].mxu1 %v463_v51 }
  0x3c   : > { %1478 = vmatprep.subr.bf16.mxu0 %v1652_v52  ;;  %1499 = vmatpush3.bf16.msra.mxu1 %v1651_v54 }
  0x3d   : > { %1034 = vmatprep.mubr.bf16.mxu0 %v462_v50  ;;  %1500 = vmatprep.subr.bf16.mxu1 %v1654_v55  ;;  %v269_v55 = vld [vmem:[#allocation2] sm:$0x3] }
  0x3e   : > { %1074 = vmatprep.mubr.bf16.mxu1 %v466_v56 }
  0x3f   : > { %1479 = vmatpush3.bf16.msra.mxu0 %v1653_v57 }
  0x40   : > { %1480 = vmatprep.subr.bf16.mxu0 %v1656_v58  ;;  %1501 = vmatpush3.bf16.msra.mxu1 %v1655_v59 }
  0x41   : > { %1502 = vmatprep.subr.bf16.mxu1 %v1658_v60 }
  0x43   : > { %1481 = vmatpush3.bf16.msra.mxu0 %v1657_v61 }
  0x44   : > { %1482 = vmatprep.subr.bf16.mxu0 %v1660_v62  ;;  %1503 = vmatpush3.bf16.msra.mxu1 %v1659_v63  ;;  %v1688_v62 = vld [vmem:[%s1984_s3] sm:$0xff] (!%p1417_p7)   ;;  %v1758_v63 = vmov (!%p1417_p7), 0.0  }
  0x45   : > { %1504 = vmatprep.subr.bf16.mxu1 %v1662_v0  ;;  %v1689_v0 = vld [vmem:[%s1984_s3 + $0x8] sm:$0xff] (!%p1417_p7)  }
  0x47   : > { %1483 = vmatpush3.bf16.msra.mxu0 %v1661_v1  ;;  %v1690_v1 = vld [vmem:[%s1984_s3 + $0x10] sm:$0xff] (!%p1417_p7)  }
  0x48   : > { %1484 = vmatprep.subr.bf16.mxu0 %v1664_v2  ;;  %1505 = vmatpush3.bf16.msra.mxu1 %v1663_v3  ;;  %v1691_v2 = vld [vmem:[%s1984_s3 + $0x18] sm:$0xff] (!%p1417_p7)   ;;  %v1692_v3 = vld [vmem:[%s1984_s3 + $0x20] sm:$0xff] (!%p1417_p7)  }
  0x49   : > { %1506 = vmatprep.subr.bf16.mxu1 %v1666_v4  ;;  %v1693_v4 = vld [vmem:[%s1984_s3 + $0x28] sm:$0xff] (!%p1417_p7)  }
  0x4b   : > { %1485 = vmatpush3.bf16.msra.mxu0 %v1665_v5 }
  0x4c   : > { %1486 = vmatprep.subr.bf16.mxu0 %v1668_v6  ;;  %1507 = vmatpush3.bf16.msra.mxu1 %v1667_v7  ;;  %v1418_v6 = vld [vmem:[%s1983_s2] ss:$0 sm:$0xff] (!%p1417_p7) }
  0x4d   : > { %1508 = vmatprep.subr.bf16.mxu1 %v1670_v8  ;;  %v1694_v8 = vld [vmem:[%s1984_s3 + $0x30] sm:$0xff] (!%p1417_p7)  }
  0x4f   : > { %1487 = vmatpush3.bf16.msra.mxu0 %v1669_v9 }
  0x50   : > { %1488 = vmatprep.subr.bf16.mxu0 %v1672_v10  ;;  %1509 = vmatpush3.bf16.msra.mxu1 %v1671_v11  ;;  %v1695_v10 = vld [vmem:[%s1984_s3 + $0x38] sm:$0xff] (!%p1417_p7)  }
  0x51   : > { %1510 = vmatprep.subr.bf16.mxu1 %v1674_v12  ;;  %v1419_v12 = vld [vmem:[%s1985_s4] ss:$0 sm:$0xff] (!%p1417_p7) }
  0x53   : > { %1489 = vmatpush3.bf16.msra.mxu0 %v1673_v13 }
  0x54   : > { %1490 = vmatprep.subr.bf16.mxu0 %v1676_v14  ;;  %1511 = vmatpush3.bf16.msra.mxu1 %v1675_v15 }
  0x55   : > { %1512 = vmatprep.subr.bf16.mxu1 %v1678_v16 }
  0x57   : > { %1491 = vmatpush3.bf16.msra.mxu0 %v1677_v17 }
  0x58   : > { %1538 = vmatprep.subr.bf16.mxu0 %v1756_v21  ;;  %1513 = vmatpush3.bf16.msra.mxu1 %v1679_v19 }
  0x5a   : > { %1035 = vmatmul.mubr.bf16.vlgmr.msra.gmra.mrb[4].mxu0 %v448_v18 }
  0x5b   : > { %1539 = vmatpush3.bf16.msra.mxu0 %v1680_v20  ;;  %1554 = vmatprep.mubr.msk.bf16.mxu0 %vm1757_vm0, %v1756_v21 }
  0x5c   : > { %1075 = vmatmul.mubr.bf16.vlgmr.msra.gmra.mrb[4].mxu1 %v464_v22  ;;  %1540 = vmatprep.subr.bf16.mxu0 %v1756_v21 }
  0x5f   : > { %1541 = vmatpush3.bf16.msra.mxu0 %v1681_v23 }
  0x60   : > { %1542 = vmatprep.subr.bf16.mxu0 %v1756_v21 }
  0x63   : > { %1543 = vmatpush3.bf16.msra.mxu0 %v1682_v24 }
  0x64   : > { %1544 = vmatprep.subr.bf16.mxu0 %v1756_v21 }
  0x67   : > { %1545 = vmatpush3.bf16.msra.mxu0 %v1683_v25 }
  0x68   : > { %1546 = vmatprep.subr.bf16.mxu0 %v1756_v21 }
  0x6b   : > { %1547 = vmatpush3.bf16.msra.mxu0 %v1684_v26 }
  0x6c   : > { %1548 = vmatprep.subr.bf16.mxu0 %v1756_v21 }
  0x6f   : > { %1549 = vmatpush3.bf16.msra.mxu0 %v1685_v27 }
  0x70   : > { %1550 = vmatprep.subr.bf16.mxu0 %v1756_v21 }
  0x73   : > { %1551 = vmatpush3.bf16.msra.mxu0 %v1686_v28 }
  0x74   : > { %1552 = vmatprep.subr.bf16.mxu0 %v1756_v21 }
  0x77   : > { %1553 = vmatpush3.bf16.msra.mxu0 %v1687_v29 }
  0x78   : > { %1558 = vmatprep.subr.bf16.mxu0 (!%p1417_p7), %v1758_v63 }
  0x7a   : > { %1555 = vmatmul.mubr.bf16.vlgmr.msra.gmra.mrb[8].mxu0 %v480_v31 }
  0x7b   : > { %1559 = vmatpush3.bf16.msra.mxu0 (!%p1417_p7), %v1688_v62  ;;  %1574 = vmatprep.mubr.msk.bf16.mxu0 (!%p1417_p7), %vm1759_vm1, %v1758_v63 }
  0x7c   : > { %1560 = vmatprep.subr.bf16.mxu0 (!%p1417_p7), %v1758_v63 }
  0x7f   : > { %1561 = vmatpush3.bf16.msra.mxu0 (!%p1417_p7), %v1689_v0 }
  0x80   : > { %1562 = vmatprep.subr.bf16.mxu0 (!%p1417_p7), %v1758_v63 }
  0x83   : > { %1563 = vmatpush3.bf16.msra.mxu0 (!%p1417_p7), %v1690_v1 }
  0x84   : > { %1564 = vmatprep.subr.bf16.mxu0 (!%p1417_p7), %v1758_v63 }
  0x87   : > { %1565 = vmatpush3.bf16.msra.mxu0 (!%p1417_p7), %v1691_v2 }
  0x88   : > { %1566 = vmatprep.subr.bf16.mxu0 (!%p1417_p7), %v1758_v63 }
  0x8b   : > { %1567 = vmatpush3.bf16.msra.mxu0 (!%p1417_p7), %v1692_v3 }
  0x8c   : > { %1568 = vmatprep.subr.bf16.mxu0 (!%p1417_p7), %v1758_v63 }
  0x8f   : > { %1569 = vmatpush3.bf16.msra.mxu0 (!%p1417_p7), %v1693_v4 }
  0x90   : > { %1570 = vmatprep.subr.bf16.mxu0 (!%p1417_p7), %v1758_v63 }
  0x93   : > { %1571 = vmatpush3.bf16.msra.mxu0 (!%p1417_p7), %v1694_v8 }
  0x94   : > { %1572 = vmatprep.subr.bf16.mxu0 (!%p1417_p7), %v1758_v63 }
  0x97   : > { %1573 = vmatpush3.bf16.msra.mxu0 (!%p1417_p7), %v1695_v10 }
 0x10d   : > { %v1448_v32 = vpop.f32.mrb[0].mxu0 }
 0x10e   : > { %v1449_v33 = vpop.f32.mrb[1].mxu0  ;;  %v1470_v34 = vpop.f32.mrb[0].mxu1 }
 0x10f   : > { %v1450_v35 = vadd.f32 %v1449_v33, %v1448_v32  ;;  %v1451_v36 = vpop.f32.mrb[2].mxu0  ;;  %v1471_v37 = vpop.f32.mrb[1].mxu1 }
 0x110   : > { %v1452_v38 = vpop.f32.mrb[3].mxu0  ;;  %v1472_v39 = vadd.f32 %v1471_v37, %v1470_v34  ;;  %v1473_v40 = vpop.f32.mrb[2].mxu1 }
 0x111   : > { %v1474_v41 = vpop.f32.mrb[3].mxu1 }
 0x112   : > { %v997_v43 = vadd.f32 %v1472_v39, %v1450_v35 }
 0x12d   : > { %v1492_v44 = vpop.f32.mrb[4].mxu0 }
 0x12e   : > { %v1493_v45 = vpop.f32.mrb[5].mxu0 }
 0x12f   : > { %v1494_v46 = vadd.f32 %v1493_v45, %v1492_v44  ;;  %v1495_v47 = vpop.f32.mrb[6].mxu0  ;;  %v1514_v48 = vpop.f32.mrb[4].mxu1 }
 0x130   : > { %v1496_v49 = vpop.f32.mrb[7].mxu0  ;;  %v1515_v42 = vpop.f32.mrb[5].mxu1 }
 0x131   : > { %v1037_v50 = vadd.f32 %v1494_v46, %v997_v43  ;;  %v1516_v51 = vadd.f32 %v1515_v42, %v1514_v48  ;;  %v1517_v52 = vpop.f32.mrb[6].mxu1 }
 0x132   : > { %v1518_v53 = vpop.f32.mrb[7].mxu1 }
 0x133   : > { %v1077_v54 = vadd.f32 %v1516_v51, %v1037_v50 }
 0x14c   : > { %1127 = sbr.rel (%p1417_p7) target bundleno = 883 (0x373), region = 48 }
 0x14d   : > { %v1116_v56 = vpop.f32.mrb[8].mxu0 }
 0x14e   : > { %v1117_v57 = vadd.f32 %v1116_v56, %v1077_v54  ;;  %v1556_v58 = vpop.f32.mrb[9].mxu0 }
 0x14f   : > { %v1119_v59 = vpop.f32.mrb[10].mxu0 }
 0x150   : > { %v1122_v60 = vadd.f32 %v1117_v57, %v269_v55  ;;  %v1557_v61 = vpop.f32.mrb[11].mxu0 }
 0x152   : > { %1123 = vst [vmem:[#allocation2] sm:$0x3] %v1122_v60 }
 0x159   : > { %v1128_v5 = vld [vmem:[#allocation2] sm:$0x3] }
 0x15a   : > { %v1136_v7 = vadd.f32 %v1418_v6, %v1128_v5 }
 0x15c   : > { %v1137_v9 = vmax.f32 %v1136_v7, 0.0 }
 0x15e   : > { %v1138_v11 = vpack.c.bf16 %v1137_v9, %v1137_v9 }
 0x160   : > { %1575 = vmatmul.mubr.bf16.vlgmr.msra.gmra.mrb[0].mxu0 %v1138_v11 }
 0x233   : > { %v1244_v13 = vpop.f32.mrb[0].mxu0 }
 0x234   : > { %v1245_v14 = vadd.f32 %v1419_v12, %v1244_v13  ;;  %v1576_v15 = vpop.f32.mrb[1].mxu0 }
 0x235   : > { %v1247_v16 = vpop.f32.mrb[2].mxu0 }
 0x236   : > { %v1577_v17 = vpop.f32.mrb[3].mxu0  ;;  %v1251_v18 = vsel %vm1250_vm2, %v1245_v14, -inf }
 0x237   : > { %1252 = vmax.xlane.f32.xlu0 %v1251_v18 }
 0x2c4   : > { %v1253_v19 = vpop.xlane.xlu0 %1252 }
 0x2c5   : > { %v1254_v20 = vsub.f32 %v1245_v14, %v1253_v19 }
 0x2c7   : > { %v1255_v21 = vmul.f32 1.442695, %v1254_v20 }
 0x2c9   : > { %1696 = vpow2.f32 %v1255_v21 }
 0x2d3   : > { %v1697_v22 = vpop.eup %1696 }
 0x2d4   : > { %v1257_v23 = vsel %vm1250_vm2, %v1697_v22, 0.0 }
 0x2d5   : > { %1258 = vadd.xlane.f32.xlu0 %v1257_v23 }
 0x362   : > { %v1259_v24 = vpop.xlane.xlu0 %1258 }
 0x363   : > { %1698 = vlog2.f32 %v1259_v24 }
 0x36d   : > { %v1699_v25 = vpop.eup %1698 }
 0x36e   : > { %v1261_v26 = vmul.f32 0.6931472, %v1699_v25 }
 0x370   : > { %v1262_v27 = vsub.f32 %v1254_v20, %v1261_v26 }
 0x372   : > { %1263 = vst [vmem:[#allocation3] sm:$0x3] %v1262_v27 }
 0x373 PF: > { %p1946_p8 = scmp.eq.s32.totalorder %s1338_s21, 7  ;;  %s1760_s7 = smov [#allocation3]  }
 0x374   : > { %s1273_s8 = sshll.u32 %s1760_s7, 4  ;;  %s1274_s8 = int_to_ptr.vmem [resolvable:$true] %s1273_s8 }
 0x375   : > { %s1700_s9 = scalar_lea.vmem %s1274_s8, 32  ;;  %p1707_p12 = scmp.lt.s32.totalorder %s1274_s8, %s1274_s8 }
 0x376   : > { %p1701_p9 = scmp.ne.s32.totalorder %s1274_s8, %s1700_s9  ;;  %p1708_p13 = scmp.lt.s32.totalorder %s1700_s9, %s1700_s9 }
 0x378   : > { %p1702_p10 = pnand %p1701_p9, %p1946_p8  ;;  %p1709_p0 = por %p1708_p13, %p1707_p12 }
 0x37a   : > { %p1703_p11 = pneg %p1702_p10 }
 0x37c   : > { %p1710_p1 = pnand %p1709_p0, %p1703_p11 }
 0x37e   : > { %1713 = shalt.err (!%p1710_p1)
}
 0x37f   : > { %s1714_s21 = scalar_lea.hbm %s1986_s5, 32 }
 0x380   : > { %p1715_p2 = scmp.ne.s32.totalorder %s1986_s5, %s1714_s21  ;;  %p1720_p5 = scmp.lt.u32.totalorder %s1714_s21, %s1986_s5 }
 0x382   : > { %p1716_p3 = pnand %p1715_p2, %p1946_p8 }
 0x384   : > { %p1717_p4 = pneg %p1716_p3 }
 0x386   : > { %p1722_p6 = pnand %p1720_p5, %p1717_p4 }
 0x388   : > { %1725 = shalt.err (!%p1722_p6)
}
 0x389   : > { %1579 = dma.vmem_to_hbm [thread:$0]  (%p1946_p8), %s1274_s8, 32, %s1986_s5, [#allocation4]  }
 0x38a   : > { %1739 = dma.done.wait (%p1946_p8), [#allocation4], 32  }
 0x38b   : > { %1741 = vsyncadd (%p1946_p8), [#allocation4], 4294967264 }
 0x38c PF: > { %s16_s20 = sadd.s32 1, %s1752_s20   ;;  %s1988_s18 = smov %s1748_s19 }
 0x38d   : > { %p13_p7 = scmp.ge.s32.totalorder %s16_s20, 10   ;;  %s1989_s19 = smov %s1991_s22 }
 0x38f   :  { %15 = sbr.rel (!%p13_p7) target bundleno = 2 (0x2), region = 79 }
 0x396   :  { %1286 = vsyncpa [#allocation4], 1 }
 0x397   :  { %1288 = vsyncpa [#allocation4 + $0x1], 1 }

</bundles_post_ra>
